<compile_context>
chip_gen: v7x
topology: tpu7x:2x2x1
jax: 0.10.0
libtpu: 0.0.40
codegen_flags: <defaults>
</compile_context>

<pallas_src>
import functools

import jax
import jax.numpy as jnp
from jax import lax
from jax.experimental import pallas as pl
from jax.experimental.pallas import tpu as pltpu


def _round_up(x, m):
    return (x + m - 1) // m * m


def _pad2(a, rows, cols):
    return jnp.pad(a, ((0, rows - a.shape[0]), (0, cols - a.shape[1])))


# ---------------------------------------------------------------------------
# Hardware / capability probes (cached; evaluated once per process).
# ---------------------------------------------------------------------------
@functools.lru_cache(maxsize=None)
def _vmem_budget_bytes():
    """Generation-aware scoped-VMEM budget (~80% of physical VMEM)."""
    try:
        cap = int(pltpu.get_tpu_info().vmem_capacity_bytes)
    except Exception:                        # conservative (v7x-sized) default
        cap = 64 * 1024 * 1024
    return int(cap * 0.8)                    # ~102 MiB v5e/v6e, ~51 MiB v7x


@functools.lru_cache(maxsize=None)
def _single_buffer_supported():
    """Probe whether pl.Buffered(buffer_count=1) (single-buffered constant
    blocks) lowers on this jax/Mosaic build; fall back to the default
    double-buffered pipeline otherwise."""
    def _copy(x_ref, o_ref):
        o_ref[...] = x_ref[...]

    try:
        spec = pl.BlockSpec((8, 128), lambda i: (0, 0),
                            pipeline_mode=pl.Buffered(buffer_count=1))
        fn = pl.pallas_call(
            _copy,
            out_shape=jax.ShapeDtypeStruct((8, 128), jnp.float32),
            grid=(1,),
            in_specs=[spec],
            out_specs=pl.BlockSpec((8, 128), lambda i: (0, 0)),
        )
        jax.block_until_ready(fn(jnp.zeros((8, 128), jnp.float32)))
        return True
    except Exception:
        return False


# ---------------------------------------------------------------------------
# Tile-size selection (VMEM-budget derived, per performance review).
# ---------------------------------------------------------------------------
def _choose_tb(B, Fp, Hp, block_b, single_buffer_w, vmem_budget):
    # Resident weight bytes in VMEM (W1/W2/w3 bf16, b1/b2 f32).
    w_resident = Fp * Hp * 2 + Hp * Hp * 2 + 2 * Hp * 4 + 16 * Hp * 2
    if not single_buffer_w:
        w_resident *= 2          # default pipeline double-buffers even constants
    # Per-batch-row VMEM bytes: double-buffered bf16 x tile + f32/bf16
    # intermediates (h1, h2, bf16 copies, matmul scratch) + output row.
    per_row = 2 * (2 * Fp) + 16 * Hp + 16
    headroom = 2 * 1024 * 1024

    tb = (vmem_budget - w_resident - headroom) // per_row
    tb = max(128, min(2048, (tb // 128) * 128))          # lane-aligned tile
    if block_b is not None:
        tb = min(tb, max(128, _round_up(block_b, 128)))
    # Don't tile past the (padded) batch ...
    tb = min(tb, max(128, _round_up(B, 128)))
    # ... and keep >= 2 tiles when the batch allows it, so the "parallel"
    # batch axis can shard across both TensorCores on v7x.
    if B > 128:
        tb = min(tb, max(128, _round_up(pl.cdiv(B, 2), 128)))
    return int(tb)


# ---------------------------------------------------------------------------
# Kernel
# ---------------------------------------------------------------------------
def _dann_mlp_kernel(x_ref, w1_ref, b1_ref, w2_ref, b2_ref, w3_ref, b3_ref,
                     out_ref):
    # Layer 1: Linear(in_feature -> hidden) + ReLU.  bf16 MXU, f32 accumulate.
    h1 = jnp.dot(x_ref[...], w1_ref[...], preferred_element_type=jnp.float32)
    h1 = jnp.maximum(h1 + b1_ref[...], 0.0)
    # (dropout1: identity at inference)

    # Layer 2: Linear(hidden -> hidden) + ReLU.
    h2 = jnp.dot(h1.astype(jnp.bfloat16), w2_ref[...],
                 preferred_element_type=jnp.float32)
    h2 = jnp.maximum(h2 + b2_ref[...], 0.0)
    # (dropout2: identity at inference)

    # Layer 3: Linear(hidden -> 1) + sigmoid, computed as a transposed-RHS MXU
    # pass (w3_rows @ h2^T, same dimension numbers as q@k^T in flash-attn) so
    # the per-tile result is a lane-dense (1, TB) row instead of a (TB, 1)
    # column -> unmasked 128-lane stores.  Only row 0 of w3_ref is real.
    logits16 = lax.dot_general(
        w3_ref[...], h2.astype(jnp.bfloat16),
        dimension_numbers=(((1,), (1,)), ((), ())),
        preferred_element_type=jnp.float32)              # (16, TB)
    logits = logits16[0:1, :] + b3_ref[0]                # b3 scalar from SMEM
    y = pl.reciprocal(1.0 + jnp.exp(-logits), approx=True)
    out_ref[...] = y.reshape(out_ref.shape).astype(out_ref.dtype)


# ---------------------------------------------------------------------------
# Wrapper
# ---------------------------------------------------------------------------
def prepare_params(params):
    """Pad/cast weights once (hoisted out of the per-call hot path)."""
    w1, b1 = params["w1"], params["b1"]
    w2, b2 = params["w2"], params["b2"]
    w3, b3 = params["w3"], params["b3"]
    F, H = w1.shape
    Fp, Hp = _round_up(F, 128), _round_up(H, 128)
    return {
        "w1": _pad2(jnp.asarray(w1), Fp, Hp).astype(jnp.bfloat16),
        "b1": _pad2(jnp.asarray(b1, jnp.float32).reshape(1, -1), 1, Hp),
        "w2": _pad2(jnp.asarray(w2), Hp, Hp).astype(jnp.bfloat16),
        "b2": _pad2(jnp.asarray(b2, jnp.float32).reshape(1, -1), 1, Hp),
        # w3 as a row vector zero-padded to 16 sublane rows (bf16 packing) so
        # the (16,Hp) x (Hp,TB)^T MXU pass has a well-tiled LHS.
        "w3": _pad2(jnp.asarray(w3).reshape(1, -1), 16, Hp).astype(jnp.bfloat16),
        "b3": jnp.asarray(b3, jnp.float32).reshape(-1)[:1],
    }


def _dann_forward_impl(x, w1, b1, w2, b2, w3, b3, *, single_buffer_w,
                       vmem_budget, block_b, task_type):
    if task_type == "reg":
        # adaptive_avg_pool2d(x, [1, 1]).reshape(B, -1)
        x = jnp.mean(x, axis=(2, 3))

    B, _ = x.shape
    Fp, Hp = w1.shape
    tb = _choose_tb(B, Fp, Hp, block_b, single_buffer_w, vmem_budget)
    Bp = _round_up(B, tb)
    n_tiles = Bp // tb

    # Batch-pad + lane-pad x, cast to bf16 for the MXU (no redundant f32 cast).
    x_p = _pad2(x, Bp, Fp).astype(jnp.bfloat16)

    def const_spec(shape):
        # Constant-index weight blocks: single-buffer them if supported (halves
        # the resident-weight VMEM footprint); otherwise default pipeline.
        kw = ({"pipeline_mode": pl.Buffered(buffer_count=1)}
              if single_buffer_w else {})
        return pl.BlockSpec(shape, lambda i: (0, 0), **kw)

    out = pl.pallas_call(
        _dann_mlp_kernel,
        out_shape=jax.ShapeDtypeStruct((n_tiles, 1, tb), jnp.float32),
        grid=(n_tiles,),
        in_specs=[
            pl.BlockSpec((tb, Fp), lambda i: (i, 0)),       # x tile (pipelined)
            const_spec((Fp, Hp)),                           # W1 (VMEM-resident)
            const_spec((1, Hp)),                            # b1
            const_spec((Hp, Hp)),                           # W2 (VMEM-resident)
            const_spec((1, Hp)),                            # b2
            const_spec((16, Hp)),                           # w3 rows
            pl.BlockSpec(memory_space=pltpu.MemorySpace.SMEM),  # b3 scalar
        ],
        out_specs=pl.BlockSpec((1, 1, tb), lambda i: (i, 0, 0)),
        compiler_params=pltpu.CompilerParams(
            dimension_semantics=("parallel",),
            vmem_limit_bytes=vmem_budget,
        ),
    )(x_p, w1, b1, w2, b2, w3, b3)

    # (n_tiles, 1, tb) lane-dense slab -> (B, 1) column.
    return out.reshape(Bp, 1)[:B]


def make_dann_discriminator(params, *, task_type="cls", block_b=None):
    """Build a jitted forward(x, max_iter=None) with weight padding/casting
    and capability probes hoisted out of the per-call hot path."""
    prep = prepare_params(params)
    impl = functools.partial(
        _dann_forward_impl,
        single_buffer_w=_single_buffer_supported(),
        vmem_budget=_vmem_budget_bytes(),
        block_b=block_b,
        task_type=task_type,
    )
    jitted = jax.jit(impl)

    def forward(x, max_iter=None):
        del max_iter  # GRL coeff is backward-only; forward output unchanged
        return jitted(x, prep["w1"], prep["b1"], prep["w2"], prep["b2"],
                      prep["w3"], prep["b3"])

    return forward


def dann_discriminator_forward(x, params, *, task_type="cls", block_b=None,
                               max_iter=None):
    """One-shot convenience wrapper (re-prepares weights each call; prefer
    make_dann_discriminator for repeated inference)."""
    return make_dann_discriminator(params, task_type=task_type,
                                   block_b=block_b)(x, max_iter)


# ---------------------------------------------------------------------------
# Test harness
# ---------------------------------------------------------------------------
def init_params(key, in_feature, hidden_size):
    """Deterministic synthetic init (xavier-normal-ish weights, zero bias)."""
    k1, k2, k3 = jax.random.split(key, 3)

    def xavier(k, fan_in, fan_out):
        std = (2.0 / (fan_in + fan_out)) ** 0.5
        return jax.random.normal(k, (fan_in, fan_out), jnp.float32) * std

    return {
        "w1": xavier(k1, in_feature, hidden_size),
        "b1": jnp.zeros((1, hidden_size), jnp.float32),
        "w2": xavier(k2, hidden_size, hidden_size),
        "b2": jnp.zeros((1, hidden_size), jnp.float32),
        "w3": xavier(k3, hidden_size, 1),
        "b3": jnp.zeros((1, 1), jnp.float32),
    }


def reference_forward(x, p):
    h1 = jnp.maximum(x @ p["w1"] + p["b1"], 0.0)
    h2 = jnp.maximum(h1 @ p["w2"] + p["b2"], 0.0)
    return jax.nn.sigmoid(h2 @ p["w3"] + p["b3"])


if __name__ == "__main__":
    key = jax.random.PRNGKey(0)
    kx, kp = jax.random.split(key)

    # Small but grid-exercising shapes: >=2 batch tiles (one partially padded),
    # 128-lane-aligned feature/hidden dims.
    batch, in_feature, hidden_size = 300, 256, 256
    x = jax.random.normal(kx, (batch, in_feature), jnp.float32)
    params = init_params(kp, in_feature, hidden_size)

    forward = make_dann_discriminator(params)
    y = jax.block_until_ready(forward(x, max_iter=1000))

    y_ref = reference_forward(x, params)
    assert y.shape == (batch, 1)
    # Relaxed tolerance: bf16 MXU inputs (f32 accumulate) + approx reciprocal.
    err = float(jnp.max(jnp.abs(y - y_ref)))
    assert err < 4e-2, f"max abs err {err}"

    print("KERNEL_OK")
</pallas_src>

<mosaic_0001>
module attributes {stable_mosaic.version = 11 : i64} {
  func.func @_copy(%arg0: i32, %arg1: memref<8x128xf32, #tpu.memory_space<vmem>>, %arg2: memref<8x128xf32, #tpu.memory_space<vmem>>) attributes {dimension_semantics = [#tpu.dimension_semantics<arbitrary>], iteration_bounds = array<i64: 1>, scalar_prefetch = 0 : i64, scratch_operands = 0 : i64, tpu.core_type = #tpu.core_type<tc>, window_params = [{pipeline_mode = #tpu.pipeline_mode<synchronous>, transform_indices = @transform_0, window_bounds = array<i64: 8, 128>}, {pipeline_mode = #tpu.pipeline_mode<synchronous>, transform_indices = @transform_1, window_bounds = array<i64: 8, 128>}]} {
    %c0 = arith.constant 0 : index
    %c0_0 = arith.constant 0 : index
    %0 = vector.load %arg1[%c0, %c0_0] : memref<8x128xf32, #tpu.memory_space<vmem>>, vector<8x128xf32>
    %c0_1 = arith.constant 0 : index
    %c0_2 = arith.constant 0 : index
    %1 = vector.load %arg2[%c0_1, %c0_2] : memref<8x128xf32, #tpu.memory_space<vmem>>, vector<8x128xf32>
    tpu.vector_store %arg2[%c0_1, %c0_2], %0 {strides = array<i32>} : memref<8x128xf32, #tpu.memory_space<vmem>>, vector<8x128xf32>,
    return
  }
  func.func @transform_0(%arg0: i32) -> (i32, i32) {
    %c0_i32 = arith.constant 0 : i32
    %c0_i32_0 = arith.constant 0 : i32
    %c0_i32_1 = arith.constant 0 : i32
    return %c0_i32, %c0_i32_0 : i32, i32
  }
  func.func @transform_1(%arg0: i32) -> (i32, i32) {
    %c0_i32 = arith.constant 0 : i32
    %c0_i32_0 = arith.constant 0 : i32
    %c0_i32_1 = arith.constant 0 : i32
    return %c0_i32, %c0_i32_0 : i32, i32
  }
}

module attributes {stable_mosaic.version = 11 : i64} {
  func.func @_dann_mlp_kernel(%arg0: i32, %arg1: memref<256x256xbf16, #tpu.memory_space<vmem>>, %arg2: memref<256x256xbf16, #tpu.memory_space<vmem>>, %arg3: memref<1x256xf32, #tpu.memory_space<vmem>>, %arg4: memref<256x256xbf16, #tpu.memory_space<vmem>>, %arg5: memref<1x256xf32, #tpu.memory_space<vmem>>, %arg6: memref<16x256xbf16, #tpu.memory_space<vmem>>, %arg7: memref<1xf32, #tpu.memory_space<smem>>, %arg8: memref<1x1x256xf32, #tpu.memory_space<vmem>>) attributes {dimension_semantics = [#tpu.dimension_semantics<parallel>], iteration_bounds = array<i64: 2>, scalar_prefetch = 0 : i64, scratch_operands = 0 : i64, tpu.core_type = #tpu.core_type<tc>, window_params = [{transform_indices = @transform_0, window_bounds = array<i64: 256, 256>}, {pipeline_mode = #tpu.pipeline_mode<synchronous>, transform_indices = @transform_1, window_bounds = array<i64: 256, 256>}, {pipeline_mode = #tpu.pipeline_mode<synchronous>, transform_indices = @transform_2, window_bounds = array<i64: 1, 256>}, {pipeline_mode = #tpu.pipeline_mode<synchronous>, transform_indices = @transform_3, window_bounds = array<i64: 256, 256>}, {pipeline_mode = #tpu.pipeline_mode<synchronous>, transform_indices = @transform_4, window_bounds = array<i64: 1, 256>}, {pipeline_mode = #tpu.pipeline_mode<synchronous>, transform_indices = @transform_5, window_bounds = array<i64: 16, 256>}, {transform_indices = @transform_6, window_bounds = array<i64: 1>}, {transform_indices = @transform_7, window_bounds = array<i64: 1, 1, 256>}]} {
    %c0 = arith.constant 0 : index
    %c0_0 = arith.constant 0 : index
    %0 = vector.load %arg1[%c0, %c0_0] : memref<256x256xbf16, #tpu.memory_space<vmem>>, vector<256x256xbf16>
    %c0_1 = arith.constant 0 : index
    %c0_2 = arith.constant 0 : index
    %1 = vector.load %arg2[%c0_1, %c0_2] : memref<256x256xbf16, #tpu.memory_space<vmem>>, vector<256x256xbf16>
    %cst = arith.constant dense<0.000000e+00> : vector<256x256xf32>
    %2 = tpu.matmul %0, %1, %cst {dimension_numbers = #tpu.dot_dimension_numbers<[1], [0], [0], [1], [0, 0, 1, 1], [], []>} : vector<256x256xbf16>, vector<256x256xbf16>, vector<256x256xf32> -> vector<256x256xf32>
    %c0_3 = arith.constant 0 : index
    %c0_4 = arith.constant 0 : index
    %3 = vector.load %arg3[%c0_3, %c0_4] : memref<1x256xf32, #tpu.memory_space<vmem>>, vector<1x256xf32>
    %4 = vector.broadcast %3 : vector<1x256xf32> to vector<256x256xf32>
    %5 = arith.addf %2, %4 : vector<256x256xf32>
    %cst_5 = arith.constant 0.000000e+00 : f32
    %6 = vector.broadcast %cst_5 : f32 to vector<256x256xf32>
    %7 = arith.maximumf %5, %6 : vector<256x256xf32>
    %8 = arith.truncf %7 : vector<256x256xf32> to vector<256x256xbf16>
    %c0_6 = arith.constant 0 : index
    %c0_7 = arith.constant 0 : index
    %9 = vector.load %arg4[%c0_6, %c0_7] : memref<256x256xbf16, #tpu.memory_space<vmem>>, vector<256x256xbf16>
    %cst_8 = arith.constant dense<0.000000e+00> : vector<256x256xf32>
    %10 = tpu.matmul %8, %9, %cst_8 {dimension_numbers = #tpu.dot_dimension_numbers<[1], [0], [0], [1], [0, 0, 1, 1], [], []>} : vector<256x256xbf16>, vector<256x256xbf16>, vector<256x256xf32> -> vector<256x256xf32>
    %c0_9 = arith.constant 0 : index
    %c0_10 = arith.constant 0 : index
    %11 = vector.load %arg5[%c0_9, %c0_10] : memref<1x256xf32, #tpu.memory_space<vmem>>, vector<1x256xf32>
    %12 = vector.broadcast %11 : vector<1x256xf32> to vector<256x256xf32>
    %13 = arith.addf %10, %12 : vector<256x256xf32>
    %cst_11 = arith.constant 0.000000e+00 : f32
    %14 = vector.broadcast %cst_11 : f32 to vector<256x256xf32>
    %15 = arith.maximumf %13, %14 : vector<256x256xf32>
    %c0_12 = arith.constant 0 : index
    %c0_13 = arith.constant 0 : index
    %16 = vector.load %arg6[%c0_12, %c0_13] : memref<16x256xbf16, #tpu.memory_space<vmem>>, vector<16x256xbf16>
    %17 = arith.truncf %15 : vector<256x256xf32> to vector<256x256xbf16>
    %cst_14 = arith.constant dense<0.000000e+00> : vector<16x256xf32>
    %18 = tpu.matmul %16, %17, %cst_14 {dimension_numbers = #tpu.dot_dimension_numbers<[1], [1], [0], [0], [0, 0, 1, 0], [], []>} : vector<16x256xbf16>, vector<256x256xbf16>, vector<16x256xf32> -> vector<16x256xf32>
    %19 = vector.extract_strided_slice %18 {offsets = [0, 0], sizes = [1, 256], strides = [1, 1]} : vector<16x256xf32> to vector<1x256xf32>
    %c0_15 = arith.constant 0 : index
    %20 = memref.load %arg7[%c0_15] : memref<1xf32, #tpu.memory_space<smem>>
    %21 = vector.broadcast %20 : f32 to vector<1x256xf32>
    %22 = arith.addf %19, %21 : vector<1x256xf32>
    %cst_16 = arith.constant 0.000000e+00 : f32
    %23 = vector.broadcast %cst_16 : f32 to vector<1x256xf32>
    %24 = arith.subf %23, %22 : vector<1x256xf32>
    %25 = math.exp %24 : vector<1x256xf32>
    %cst_17 = arith.constant 1.000000e+00 : f32
    %26 = vector.broadcast %cst_17 : f32 to vector<1x256xf32>
    %27 = arith.addf %26, %25 : vector<1x256xf32>
    %28 = tpu.reciprocal %27 {approx = true} : vector<1x256xf32> -> vector<1x256xf32>
    %29 = vector.shape_cast %28 : vector<1x256xf32> to vector<1x1x256xf32>
    %c0_18 = arith.constant 0 : index
    %c0_19 = arith.constant 0 : index
    %c0_20 = arith.constant 0 : index
    %30 = vector.load %arg8[%c0_18, %c0_19, %c0_20] : memref<1x1x256xf32, #tpu.memory_space<vmem>>, vector<1x1x256xf32>
    tpu.vector_store %arg8[%c0_18, %c0_19, %c0_20], %29 {strides = array<i32>} : memref<1x1x256xf32, #tpu.memory_space<vmem>>, vector<1x1x256xf32>,
    return
  }
  func.func @transform_0(%arg0: i32) -> (i32, i32) {
    %c0_i32 = arith.constant 0 : i32
    %c0_i32_0 = arith.constant 0 : i32
    return %arg0, %c0_i32 : i32, i32
  }
  func.func @transform_1(%arg0: i32) -> (i32, i32) {
    %c0_i32 = arith.constant 0 : i32
    %c0_i32_0 = arith.constant 0 : i32
    %c0_i32_1 = arith.constant 0 : i32
    return %c0_i32, %c0_i32_0 : i32, i32
  }
  func.func @transform_2(%arg0: i32) -> (i32, i32) {
    %c0_i32 = arith.constant 0 : i32
    %c0_i32_0 = arith.constant 0 : i32
    %c0_i32_1 = arith.constant 0 : i32
    return %c0_i32, %c0_i32_0 : i32, i32
  }
  func.func @transform_3(%arg0: i32) -> (i32, i32) {
    %c0_i32 = arith.constant 0 : i32
    %c0_i32_0 = arith.constant 0 : i32
    %c0_i32_1 = arith.constant 0 : i32
    return %c0_i32, %c0_i32_0 : i32, i32
  }
  func.func @transform_4(%arg0: i32) -> (i32, i32) {
    %c0_i32 = arith.constant 0 : i32
    %c0_i32_0 = arith.constant 0 : i32
    %c0_i32_1 = arith.constant 0 : i32
    return %c0_i32, %c0_i32_0 : i32, i32
  }
  func.func @transform_5(%arg0: i32) -> (i32, i32) {
    %c0_i32 = arith.constant 0 : i32
    %c0_i32_0 = arith.constant 0 : i32
    %c0_i32_1 = arith.constant 0 : i32
    return %c0_i32, %c0_i32_0 : i32, i32
  }
  func.func @transform_6(%arg0: i32) -> i32 {
    %c0_i32 = arith.constant 0 : i32
    %c0_i32_0 = arith.constant 0 : i32
    return %c0_i32 : i32
  }
  func.func @transform_7(%arg0: i32) -> (i32, i32, i32) {
    %c0_i32 = arith.constant 0 : i32
    %c0_i32_0 = arith.constant 0 : i32
    %c0_i32_1 = arith.constant 0 : i32
    return %arg0, %c0_i32, %c0_i32_0 : i32, i32, i32
  }
}

</mosaic_0001>

<bundles_post_ra>
// kernel: tpu_custom_call.1
= control target key start
LH: loop header
LB: loop body
LE: loop exit
PB: predicated region body
PF: predicated region fallthrough
CT: control target
= control target key end

     0   :  { %6 = vsyncpa [#allocation3], 0  ;;  %s124_s0 = inlined_call_operand.hbm [shape: f32[8,128], index: 0, kind: input, shape index: {}]   ;;  %s125_s1 = inlined_call_operand.hbm [shape: f32[8,128], index: 1, kind: output, shape index: {}]  }
   0x1   :  { %7 = vsyncpa [#allocation4], 0  ;;  %s88_s6 = smov [#allocation2]   ;;  %s40_s10 = scalar_lea.hbm %s124_s0, 128 }
   0x2   :  { %s14_s7 = sshll.u32 %s88_s6, 4  ;;  %p41_p0 = scmp.ne.s32.totalorder %s124_s0, %s40_s10  ;;  %s15_s7 = int_to_ptr.vmem [resolvable:$true] %s14_s7 }
   0x3   :  { %p44_p1 = scmp.lt.u32.totalorder %s40_s10, %s124_s0 }
   0x5   :  { %p46_p2 = pnand %p44_p1, %p41_p0 }
   0x7   :  { %49 = shalt.err (!%p46_p2)
}
   0x8   :  { %s50_s15 = scalar_lea.vmem %s15_s7, 128  ;;  %p55_p4 = scmp.lt.s32.totalorder %s15_s7, %s15_s7 }
   0x9   :  { %p51_p3 = scmp.ne.s32.totalorder %s15_s7, %s50_s15  ;;  %p56_p5 = scmp.lt.s32.totalorder %s50_s15, %s50_s15 }
   0xb   :  { %p57_p6 = por %p56_p5, %p55_p4 }
   0xd   :  { %p58_p7 = pnand %p57_p6, %p51_p3 }
   0xf   :  { %61 = shalt.err (!%p58_p7)
}
  0x10   :  { %17 = dma.hbm_to_vmem [thread:$0]  %s124_s0, 128, %s15_s7, [#allocation3]  }
  0x11   :  { %84 = dma.done.wait [#allocation3], 128  }
  0x12   :  { %85 = vsyncadd [#allocation3], 4294967168  ;;  %s89_s18 = smov [#allocation5]   ;;  %v21_v0 = vld [vmem:[#allocation2] sm:$0xff] }
  0x13   :  { %s29_s19 = sshll.u32 %s89_s18, 4  ;;  %22 = vst [vmem:[#allocation5] sm:$0xff] %v21_v0  ;;  %s30_s19 = int_to_ptr.vmem [resolvable:$true] %s29_s19 }
  0x14   :  { %s62_s20 = scalar_lea.vmem %s30_s19, 128  ;;  %p67_p9 = scmp.lt.s32.totalorder %s30_s19, %s30_s19 }
  0x15   :  { %p63_p8 = scmp.ne.s32.totalorder %s30_s19, %s62_s20  ;;  %p68_p10 = scmp.lt.s32.totalorder %s62_s20, %s62_s20 }
  0x17   :  { %p69_p11 = por %p68_p10, %p67_p9 }
  0x19   :  { %p70_p12 = pnand %p69_p11, %p63_p8 }
  0x1b   :  { %73 = shalt.err (!%p70_p12)
}
  0x1c   :  { %s74_s23 = scalar_lea.hbm %s125_s1, 128 }
  0x1d   :  { %p75_p13 = scmp.ne.s32.totalorder %s125_s1, %s74_s23  ;;  %p78_p0 = scmp.lt.u32.totalorder %s74_s23, %s125_s1 }
  0x1f   :  { %p80_p1 = pnand %p78_p0, %p75_p13 }
  0x21   :  { %83 = shalt.err (!%p80_p1)
}
  0x22   :  { %32 = dma.vmem_to_hbm [thread:$0]  %s30_s19, 128, %s125_s1, [#allocation4]  }
  0x23   :  { %86 = dma.done.wait [#allocation4], 128  }
  0x24   :  { %87 = vsyncadd [#allocation4], 4294967168 }
  0x25   :  { %36 = vsyncpa [#allocation3], 1 }
  0x26   :  { %37 = vsyncpa [#allocation4], 1 }

// kernel: _dann_forward_impl.1
= control target key start
LH: loop header
LB: loop body
LE: loop exit
PB: predicated region body
PF: predicated region fallthrough
CT: control target
= control target key end

     0   :  { %s1930_s26 = smov 0   ;;  %s2341_s0 = inlined_call_operand.vmem [shape: bf16[512,256], index: 0, kind: input, shape index: {}]   ;;  %s2342_s1 = inlined_call_operand.vmem [shape: bf16[256,256], index: 1, kind: input, shape index: {}]   ;;  %s2343_s2 = inlined_call_operand.vmem [shape: f32[1,256], index: 2, kind: input, shape index: {}]   ;;  %s2344_s3 = inlined_call_operand.vmem [shape: bf16[256,256], index: 3, kind: input, shape index: {}]   ;;  %s2345_s4 = inlined_call_operand.vmem [shape: f32[1,256], index: 4, kind: input, shape index: {}]   ;;  %s2346_s5 = inlined_call_operand.vmem [shape: bf16[16,256], index: 5, kind: input, shape index: {}]   ;;  %s2347_s6 = inlined_call_operand.<no memory space> [shape: f32[1], index: 6, kind: input, shape index: {}]   ;;  %s2348_s7 = inlined_call_operand.vmem [shape: f32[2,1,256], index: 7, kind: output, shape index: {}]  }
   0x1   :  { %12 = sst [smem:[#allocation2]] %s2347_s6 }
   0x2 LB: > { %s1936_s27 = sadd.s32 4294967295, %s1884_s26   ;;  %p1608_p0 = scmp.ge.s32.totalorder %s1884_s26, 1  ;;  %s1884_s26 = sphi %s1930_s26, %s18_s26  }
   0x3   : > { %p240_p1 = scmp.lt.s32.totalorder %s1884_s26, 3 }
   0x5   : > { %p241_p2 = pnand %p1608_p0, %p240_p1 }
   0x6   : > { %v1723_v0 = vld [vmem:[%s2342_s1 + $0x4] ss:$8 sps:$4 sm:$0xff] (!%p241_p2)   ;;  %v1725_v1 = vld [vmem:[%s2342_s1] ss:$8 sps:$4 sm:$0xff] (!%p241_p2)   ;;  %v1726_v2 = vld [vmem:[%s2342_s1 + $0x14] ss:$8 sps:$4 sm:$0xff] (!%p241_p2)  }
   0x7   : > { %244 = sbr.rel (%p241_p2) target bundleno = 892 (0x37c), region = 48  ;;  %679 = vmatprep.subr.bf16.mxu0 (!%p241_p2), %v1723_v0  ;;  %v1728_v3 = vld [vmem:[%s2342_s1 + $0x10] ss:$8 sps:$4 sm:$0xff] (!%p241_p2)   ;;  %v1729_v4 = vld [vmem:[%s2342_s1 + $0x24] ss:$8 sps:$4 sm:$0xff] (!%p241_p2)   ;;  %s1609_s14 = sshll.u32 (!%p241_p2), %s1936_s27, 5 }
   0x8   : > { %680 = vmatpush1.bf16.msra.mxu0 (!%p241_p2), %v1725_v1  ;;  %v1731_v5 = vld [vmem:[%s2342_s1 + $0x20] ss:$8 sps:$4 sm:$0xff] (!%p241_p2)   ;;  %v1732_v6 = vld [vmem:[%s2342_s1 + $0x34] ss:$8 sps:$4 sm:$0xff] (!%p241_p2)   ;;  %p273_p3 = scmp.lt.s32.totalorder (!%p241_p2), %s1609_s14, 63  ;;  %s1514_s17 = sld [smem:[#allocation2]] (!%p241_p2) }
   0x9   : > { %681 = vmatprep.subr.bf16.mxu0 (!%p241_p2), %v1726_v2  ;;  %v1734_v7 = vld [vmem:[%s2342_s1 + $0x30] ss:$8 sps:$4 sm:$0xff] (!%p241_p2)   ;;  %v1735_v8 = vld [vmem:[%s2342_s1 + $0x44] ss:$8 sps:$4 sm:$0xff] (!%p241_p2)   ;;  %v1737_v9 = vld [vmem:[%s2342_s1 + $0x40] ss:$8 sps:$4 sm:$0xff] (!%p241_p2)  }
   0xa   : > { %v1738_v10 = vld [vmem:[%s2342_s1 + $0x54] ss:$8 sps:$4 sm:$0xff] (!%p241_p2)   ;;  %v1740_v11 = vld [vmem:[%s2342_s1 + $0x50] ss:$8 sps:$4 sm:$0xff] (!%p241_p2)   ;;  %v1741_v12 = vld [vmem:[%s2342_s1 + $0x64] ss:$8 sps:$4 sm:$0xff] (!%p241_p2)  }
   0xb   : > { %v1743_v14 = vld [vmem:[%s2342_s1 + $0x60] ss:$8 sps:$4 sm:$0xff] (!%p241_p2)   ;;  %v1744_v15 = vld [vmem:[%s2342_s1 + $0x74] ss:$8 sps:$4 sm:$0xff] (!%p241_p2)   ;;  %v1746_v16 = vld [vmem:[%s2342_s1 + $0x70] ss:$8 sps:$4 sm:$0xff] (!%p241_p2)  }
   0xc   : > { %682 = vmatpush1.bf16.msra.mxu0 (!%p241_p2), %v1728_v3  ;;  %v1747_v17 = vld [vmem:[%s2342_s1 + $0x84] ss:$8 sps:$4 sm:$0xff] (!%p241_p2)   ;;  %v1749_v18 = vld [vmem:[%s2342_s1 + $0x80] ss:$8 sps:$4 sm:$0xff] (!%p241_p2)   ;;  %v1750_v19 = vld [vmem:[%s2342_s1 + $0x94] ss:$8 sps:$4 sm:$0xff] (!%p241_p2)  }
   0xd   : > { %683 = vmatprep.subr.bf16.mxu0 (!%p241_p2), %v1729_v4  ;;  %v1752_v20 = vld [vmem:[%s2342_s1 + $0x90] ss:$8 sps:$4 sm:$0xff] (!%p241_p2)   ;;  %v1753_v21 = vld [vmem:[%s2342_s1 + $0xa4] ss:$8 sps:$4 sm:$0xff] (!%p241_p2)   ;;  %v1755_v22 = vld [vmem:[%s2342_s1 + $0xa0] ss:$8 sps:$4 sm:$0xff] (!%p241_p2)  }
   0xe   : > { %s2350_s14 = smov (!%p273_p3, %s1609_s14), 63  ;;  %v1756_v23 = vld [vmem:[%s2342_s1 + $0xb4] ss:$8 sps:$4 sm:$0xff]   ;;  %v1758_v24 = vld [vmem:[%s2342_s1 + $0xb0] ss:$8 sps:$4 sm:$0xff]   ;;  %p279_p4 = scmp.lt.s32.totalorder %s1936_s27, 1 }
   0xf   : > { %s1713_s29 = sshll.u32 %s2350_s14, 3  ;;  %v1759_v25 = vld [vmem:[%s2342_s1 + $0xc4] ss:$8 sps:$4 sm:$0xff]   ;;  %v1761_v26 = vld [vmem:[%s2342_s1 + $0xc0] ss:$8 sps:$4 sm:$0xff]  }
  0x10   : > { %684 = vmatpush1.bf16.msra.mxu0 %v1731_v5  ;;  %s1980_s10 = scalar_lea.vmem %s2341_s0, %s1713_s29  ;;  %v1762_v27 = vld [vmem:[%s2342_s1 + $0xd4] ss:$8 sps:$4 sm:$0xff]   ;;  %v1764_v28 = vld [vmem:[%s2342_s1 + $0xd0] ss:$8 sps:$4 sm:$0xff]   ;;  %v1765_v29 = vld [vmem:[%s2342_s1 + $0xe4] ss:$8 sps:$4 sm:$0xff]  }
  0x11   : > { %685 = vmatprep.subr.bf16.mxu0 %v1732_v6  ;;  %v1773_v13 = vld [vmem:[%s1980_s10 + $0x4] ss:$8 sps:$4 sm:$0xff]   ;;  %v1767_v30 = vld [vmem:[%s2342_s1 + $0xe0] ss:$8 sps:$4 sm:$0xff]   ;;  %v1768_v31 = vld [vmem:[%s2342_s1 + $0xf4] ss:$8 sps:$4 sm:$0xff]  }
  0x12   : > { %711 = vmatprep.mubr.bf16.mxu0 %v1773_v13  ;;  %v1819_v32 = vld [vmem:[%s2344_s3 + $0x4] ss:$8 sps:$4 sm:$0xff]   ;;  %v1821_v33 = vld [vmem:[%s2344_s3] ss:$8 sps:$4 sm:$0xff]   ;;  %v1822_v34 = vld [vmem:[%s2344_s3 + $0x14] ss:$8 sps:$4 sm:$0xff]  }
  0x13   : > { %v1770_v35 = vld [vmem:[%s2342_s1 + $0xf0] ss:$8 sps:$4 sm:$0xff]   ;;  %1172 = vmatprep.subr.bf16.mxu1 %v1819_v32  ;;  %v1771_v37 = vld [vmem:[%s1980_s10] ss:$8 sps:$4 sm:$0xff]   ;;  %v1825_v38 = vld [vmem:[%s2344_s3 + $0x24] ss:$8 sps:$4 sm:$0xff]   ;;  %v349_v32 = vlaneseq }
  0x14   : > { %686 = vmatpush1.bf16.msra.mxu0 %v1734_v7  ;;  %1173 = vmatpush1.bf16.msra.mxu1 %v1821_v33  ;;  %v1824_v36 = vld [vmem:[%s2344_s3 + $0x10] ss:$8 sps:$4 sm:$0xff]   ;;  %v1774_v39 = vld [vmem:[%s1980_s10 + $0x14] ss:$8 sps:$4 sm:$0xff]   ;;  %v1827_v40 = vld [vmem:[%s2344_s3 + $0x20] ss:$8 sps:$4 sm:$0xff]  }
  0x15   : > { %687 = vmatprep.subr.bf16.mxu0 %v1735_v8  ;;  %1174 = vmatprep.subr.bf16.mxu1 %v1822_v34  ;;  %v1828_v41 = vld [vmem:[%s2344_s3 + $0x34] ss:$8 sps:$4 sm:$0xff]   ;;  %v1830_v42 = vld [vmem:[%s2344_s3 + $0x30] ss:$8 sps:$4 sm:$0xff]   ;;  %v1831_v44 = vld [vmem:[%s2344_s3 + $0x44] ss:$8 sps:$4 sm:$0xff]  }
  0x16   : > { %v1776_v43 = vld [vmem:[%s1980_s10 + $0x10] ss:$8 sps:$4 sm:$0xff]   ;;  %v1777_v45 = vld [vmem:[%s1980_s10 + $0x24] ss:$8 sps:$4 sm:$0xff]   ;;  %v1833_v46 = vld [vmem:[%s2344_s3 + $0x40] ss:$8 sps:$4 sm:$0xff]  }
  0x17   : > { %v1834_v47 = vld [vmem:[%s2344_s3 + $0x54] ss:$8 sps:$4 sm:$0xff]   ;;  %v1836_v48 = vld [vmem:[%s2344_s3 + $0x50] ss:$8 sps:$4 sm:$0xff]   ;;  %v1779_v49 = vld [vmem:[%s1980_s10 + $0x20] ss:$8 sps:$4 sm:$0xff]  }
  0x18   : > { %688 = vmatpush1.bf16.msra.mxu0 %v1737_v9  ;;  %1175 = vmatpush1.bf16.msra.mxu1 %v1824_v36  ;;  %v1837_v50 = vld [vmem:[%s2344_s3 + $0x64] ss:$8 sps:$4 sm:$0xff]   ;;  %v1780_v51 = vld [vmem:[%s1980_s10 + $0x34] ss:$8 sps:$4 sm:$0xff]   ;;  %v1839_v52 = vld [vmem:[%s2344_s3 + $0x60] ss:$8 sps:$4 sm:$0xff]  }
  0x19   : > { %689 = vmatprep.subr.bf16.mxu0 %v1738_v10  ;;  %1176 = vmatprep.subr.bf16.mxu1 %v1825_v38  ;;  %v1840_v53 = vld [vmem:[%s2344_s3 + $0x74] ss:$8 sps:$4 sm:$0xff]   ;;  %v1842_v54 = vld [vmem:[%s2344_s3 + $0x70] ss:$8 sps:$4 sm:$0xff]   ;;  %v1843_v56 = vld [vmem:[%s2344_s3 + $0x84] ss:$8 sps:$4 sm:$0xff]  }
  0x1a   : > { %v1782_v55 = vld [vmem:[%s1980_s10 + $0x30] ss:$8 sps:$4 sm:$0xff]   ;;  %v1783_v57 = vld [vmem:[%s1980_s10 + $0x44] ss:$8 sps:$4 sm:$0xff]   ;;  %v1845_v58 = vld [vmem:[%s2344_s3 + $0x80] ss:$8 sps:$4 sm:$0xff]  }
  0x1b   : > { %v1846_v59 = vld [vmem:[%s2344_s3 + $0x94] ss:$8 sps:$4 sm:$0xff]   ;;  %v1848_v60 = vld [vmem:[%s2344_s3 + $0x90] ss:$8 sps:$4 sm:$0xff]   ;;  %v1785_v61 = vld [vmem:[%s1980_s10 + $0x40] ss:$8 sps:$4 sm:$0xff]  }
  0x1c   : > { %690 = vmatpush1.bf16.msra.mxu0 %v1740_v11  ;;  %1177 = vmatpush1.bf16.msra.mxu1 %v1827_v40  ;;  %v1849_v62 = vld [vmem:[%s2344_s3 + $0xa4] ss:$8 sps:$4 sm:$0xff]   ;;  %v1786_v63 = vld [vmem:[%s1980_s10 + $0x54] ss:$8 sps:$4 sm:$0xff]   ;;  %v1851_v0 = vld [vmem:[%s2344_s3 + $0xa0] ss:$8 sps:$4 sm:$0xff]  }
  0x1d   : > { %691 = vmatprep.subr.bf16.mxu0 %v1741_v12  ;;  %1178 = vmatprep.subr.bf16.mxu1 %v1828_v41  ;;  %v1852_v1 = vld [vmem:[%s2344_s3 + $0xb4] ss:$8 sps:$4 sm:$0xff]   ;;  %v1854_v2 = vld [vmem:[%s2344_s3 + $0xb0] ss:$8 sps:$4 sm:$0xff]   ;;  %v1855_v4 = vld [vmem:[%s2344_s3 + $0xc4] ss:$8 sps:$4 sm:$0xff]  }
  0x1e   : > { %v1788_v3 = vld [vmem:[%s1980_s10 + $0x50] ss:$8 sps:$4 sm:$0xff]   ;;  %v1789_v5 = vld [vmem:[%s1980_s10 + $0x64] ss:$8 sps:$4 sm:$0xff]   ;;  %v1857_v6 = vld [vmem:[%s2344_s3 + $0xc0] ss:$8 sps:$4 sm:$0xff]  }
  0x1f   : > { %v1858_v7 = vld [vmem:[%s2344_s3 + $0xd4] ss:$8 sps:$4 sm:$0xff]   ;;  %v1791_v8 = vld [vmem:[%s1980_s10 + $0x60] ss:$8 sps:$4 sm:$0xff]   ;;  %v1794_v10 = vld [vmem:[%s1980_s10 + $0x70] ss:$8 sps:$4 sm:$0xff]  }
  0x20   : > { %692 = vmatpush1.bf16.msra.mxu0 %v1743_v14  ;;  %1179 = vmatpush1.bf16.msra.mxu1 %v1830_v42  ;;  %v1792_v9 = vld [vmem:[%s1980_s10 + $0x74] ss:$8 sps:$4 sm:$0xff]   ;;  %v1795_v11 = vld [vmem:[%s1980_s10 + $0x84] ss:$8 sps:$4 sm:$0xff]   ;;  %v1797_v12 = vld [vmem:[%s1980_s10 + $0x80] ss:$8 sps:$4 sm:$0xff]  }
  0x21   : > { %693 = vmatprep.subr.bf16.mxu0 %v1744_v15  ;;  %1180 = vmatprep.subr.bf16.mxu1 %v1831_v44  ;;  %v1798_v13 = vld [vmem:[%s1980_s10 + $0x94] ss:$8 sps:$4 sm:$0xff]   ;;  %v1800_v14 = vld [vmem:[%s1980_s10 + $0x90] ss:$8 sps:$4 sm:$0xff]   ;;  %v1801_v15 = vld [vmem:[%s1980_s10 + $0xa4] ss:$8 sps:$4 sm:$0xff]  }
  0x22   : > { %v2171_v33 = vshrl.u32 %v349_v32, 7  ;;  %s2352_s27 = smov (!%p279_p4, %s1936_s27), 1  ;;  %vm1548_vm0 = vcmp.lt.s32.totalorder %v349_v32, 256 }
  0x23   : > { %s1612_s18 = sshll.u32 %s2352_s27, 1 }
  0x24   : > { %694 = vmatpush1.bf16.msra.mxu0 %v1746_v16  ;;  %1181 = vmatpush1.bf16.msra.mxu1 %v1833_v46  ;;  %v1803_v16 = vld [vmem:[%s1980_s10 + $0xa0] ss:$8 sps:$4 sm:$0xff]   ;;  %v351_v34 = vsub.s32 0, %v2171_v33  ;;  %v355_v36 = vsub.s32 1, %v2171_v33  ;;  %s282_s21 = scalar_lea.vmem %s2348_s7, %s1612_s18 }
  0x25   : > { %695 = vmatprep.subr.bf16.mxu0 %v1747_v17  ;;  %1182 = vmatprep.subr.bf16.mxu1 %v1834_v47  ;;  %v1804_v17 = vld [vmem:[%s1980_s10 + $0xb4] ss:$8 sps:$4 sm:$0xff]  }
  0x28   : > { %696 = vmatpush1.bf16.msra.mxu0 %v1749_v18  ;;  %1183 = vmatpush1.bf16.msra.mxu1 %v1836_v48  ;;  %v1860_v18 = vld [vmem:[%s2344_s3 + $0xd0] ss:$8 sps:$4 sm:$0xff]  }
  0x29   : > { %697 = vmatprep.subr.bf16.mxu0 %v1750_v19  ;;  %1184 = vmatprep.subr.bf16.mxu1 %v1837_v50  ;;  %v1806_v19 = vld [vmem:[%s1980_s10 + $0xb0] ss:$8 sps:$4 sm:$0xff]  }
  0x2c   : > { %698 = vmatpush1.bf16.msra.mxu0 %v1752_v20  ;;  %1185 = vmatpush1.bf16.msra.mxu1 %v1839_v52  ;;  %v1861_v20 = vld [vmem:[%s2344_s3 + $0xe4] ss:$8 sps:$4 sm:$0xff]  }
  0x2d   : > { %699 = vmatprep.subr.bf16.mxu0 %v1753_v21  ;;  %1186 = vmatprep.subr.bf16.mxu1 %v1840_v53  ;;  %v1807_v21 = vld [vmem:[%s1980_s10 + $0xc4] ss:$8 sps:$4 sm:$0xff]  }
  0x30   : > { %700 = vmatpush1.bf16.msra.mxu0 %v1755_v22  ;;  %1187 = vmatpush1.bf16.msra.mxu1 %v1842_v54  ;;  %v1863_v22 = vld [vmem:[%s2344_s3 + $0xe0] ss:$8 sps:$4 sm:$0xff]  }
  0x31   : > { %701 = vmatprep.subr.bf16.mxu0 %v1756_v23  ;;  %1188 = vmatprep.subr.bf16.mxu1 %v1843_v56  ;;  %v1864_v23 = vld [vmem:[%s2344_s3 + $0xf4] ss:$8 sps:$4 sm:$0xff]  }
  0x34   : > { %702 = vmatpush1.bf16.msra.mxu0 %v1758_v24  ;;  %1189 = vmatpush1.bf16.msra.mxu1 %v1845_v58  ;;  %v1866_v24 = vld [vmem:[%s2344_s3 + $0xf0] ss:$8 sps:$4 sm:$0xff]  }
  0x35   : > { %703 = vmatprep.subr.bf16.mxu0 %v1759_v25  ;;  %1190 = vmatprep.subr.bf16.mxu1 %v1846_v59  ;;  %v1809_v25 = vld [vmem:[%s1980_s10 + $0xc0] ss:$8 sps:$4 sm:$0xff]  }
  0x38   : > { %704 = vmatpush1.bf16.msra.mxu0 %v1761_v26  ;;  %1191 = vmatpush1.bf16.msra.mxu1 %v1848_v60  ;;  %v1810_v26 = vld [vmem:[%s1980_s10 + $0xd4] ss:$8 sps:$4 sm:$0xff]  }
  0x39   : > { %705 = vmatprep.subr.bf16.mxu0 %v1762_v27  ;;  %1192 = vmatprep.subr.bf16.mxu1 %v1849_v62  ;;  %v1812_v27 = vld [vmem:[%s1980_s10 + $0xd0] ss:$8 sps:$4 sm:$0xff]  }
  0x3c   : > { %706 = vmatpush1.bf16.msra.mxu0 %v1764_v28  ;;  %1193 = vmatpush1.bf16.msra.mxu1 %v1851_v0  ;;  %v1813_v28 = vld [vmem:[%s1980_s10 + $0xe4] ss:$8 sps:$4 sm:$0xff]  }
  0x3d   : > { %707 = vmatprep.subr.bf16.mxu0 %v1765_v29  ;;  %1194 = vmatprep.subr.bf16.mxu1 %v1852_v1  ;;  %v1815_v29 = vld [vmem:[%s1980_s10 + $0xe0] ss:$8 sps:$4 sm:$0xff]  }
  0x40   : > { %708 = vmatpush1.bf16.msra.mxu0 %v1767_v30  ;;  %1195 = vmatpush1.bf16.msra.mxu1 %v1854_v2  ;;  %v1816_v30 = vld [vmem:[%s1980_s10 + $0xf4] ss:$8 sps:$4 sm:$0xff]  }
  0x41   : > { %709 = vmatprep.subr.bf16.mxu0 %v1768_v31  ;;  %1196 = vmatprep.subr.bf16.mxu1 %v1855_v4  ;;  %v1818_v31 = vld [vmem:[%s1980_s10 + $0xf0] ss:$8 sps:$4 sm:$0xff]  }
  0x44   : > { %710 = vmatpush1.bf16.msra.mxu0 %v1770_v35  ;;  %1197 = vmatpush1.bf16.msra.mxu1 %v1857_v6  ;;  %v347_v35 = vld [vmem:[%s2343_s2] sm:$0x3] }
  0x45   : > { %1198 = vmatprep.subr.bf16.mxu1 %v1858_v7  ;;  %v2184_v38 = vrot.slane %v347_v35, %v355_v36 }
  0x47   : > { %712 = vmatmul.mubr.bf16.vlgmr.msra.gmra.mrb[0].mxu0 %v1771_v37  ;;  %v2180_v37 = vrot.slane %v347_v35, %v351_v34 }
  0x48   : > { %721 = vmatprep.mubr.bf16.mxu0 %v1774_v39  ;;  %1199 = vmatpush1.bf16.msra.mxu1 %v1860_v18 }
  0x49   : > { %1200 = vmatprep.subr.bf16.mxu1 %v1861_v20 }
  0x4c   : > { %1201 = vmatpush1.bf16.msra.mxu1 %v1863_v22 }
  0x4d   : > { %1202 = vmatprep.subr.bf16.mxu1 %v1864_v23 }
  0x4f   : > { %722 = vmatmul.mubr.bf16.gmra.mrb[4].mxu0 %v1776_v43 }
  0x50   : > { %731 = vmatprep.mubr.bf16.mxu0 %v1777_v45  ;;  %1203 = vmatpush1.bf16.msra.mxu1 %v1866_v24 }
  0x57   : > { %732 = vmatmul.mubr.bf16.gmra.mrb[8].mxu0 %v1779_v49 }
  0x58   : > { %741 = vmatprep.mubr.bf16.mxu0 %v1780_v51 }
  0x5f   : > { %742 = vmatmul.mubr.bf16.gmra.mrb[12].mxu0 %v1782_v55 }
  0x60   : > { %751 = vmatprep.mubr.bf16.mxu0 %v1783_v57 }
  0x67   : > { %752 = vmatmul.mubr.bf16.gmra.mrb[16].mxu0 %v1785_v61 }
  0x68   : > { %761 = vmatprep.mubr.bf16.mxu0 %v1786_v63 }
  0x6f   : > { %762 = vmatmul.mubr.bf16.gmra.mrb[20].mxu0 %v1788_v3 }
  0x70   : > { %771 = vmatprep.mubr.bf16.mxu0 %v1789_v5 }
  0x77   : > { %772 = vmatmul.mubr.bf16.gmra.mrb[24].mxu0 %v1791_v8 }
  0x78   : > { %781 = vmatprep.mubr.bf16.mxu0 %v1792_v9 }
  0x7f   : > { %782 = vmatmul.mubr.bf16.gmra.mrb[28].mxu0 %v1794_v10 }
  0x80   : > { %791 = vmatprep.mubr.bf16.mxu0 %v1795_v11 }
  0x87   : > { %792 = vmatmul.mubr.bf16.gmra.mrb[32].mxu0 %v1797_v12 }
  0x88   : > { %801 = vmatprep.mubr.bf16.mxu0 %v1798_v13 }
  0x8f   : > { %802 = vmatmul.mubr.bf16.gmra.mrb[36].mxu0 %v1800_v14 }
  0x90   : > { %811 = vmatprep.mubr.bf16.mxu0 %v1801_v15 }
  0x97   : > { %812 = vmatmul.mubr.bf16.gmra.mrb[40].mxu0 %v1803_v16 }
  0x98   : > { %821 = vmatprep.mubr.bf16.mxu0 %v1804_v17 }
  0x9f   : > { %822 = vmatmul.mubr.bf16.gmra.mrb[44].mxu0 %v1806_v19 }
  0xa0   : > { %831 = vmatprep.mubr.bf16.mxu0 %v1807_v21 }
  0xa7   : > { %832 = vmatmul.mubr.bf16.gmra.mrb[48].mxu0 %v1809_v25 }
  0xa8   : > { %841 = vmatprep.mubr.bf16.mxu0 %v1810_v26 }
  0xaf   : > { %842 = vmatmul.mubr.bf16.gmra.mrb[52].mxu0 %v1812_v27 }
  0xb0   : > { %851 = vmatprep.mubr.bf16.mxu0 %v1813_v28 }
  0xb7   : > { %852 = vmatmul.mubr.bf16.gmra.mrb[56].mxu0 %v1815_v29 }
  0xb8   : > { %861 = vmatprep.mubr.bf16.mxu0 %v1816_v30 }
  0xbf   : > { %862 = vmatmul.mubr.bf16.gmra.mrb[60].mxu0 %v1818_v31 }
 0x11a   : > { %v713_v39 = vpop.f32.mrb[0].mxu0 }
 0x11b   : > { %v714_v40 = vadd.f32 %v713_v39, %v2180_v37  ;;  %v715_v41 = vpop.f32.mrb[1].mxu0 }
 0x11c   : > { %v716_v42 = vadd.f32 %v715_v41, %v2184_v38  ;;  %v717_v43 = vpop.f32.mrb[2].mxu0 }
 0x11d   : > { %v718_v44 = vadd.f32 %v717_v43, %v2180_v37  ;;  %v719_v45 = vpop.f32.mrb[3].mxu0  ;;  %v872_v47 = vmax.f32 %v714_v40, 0.0 }
 0x11e   : > { %v720_v46 = vadd.f32 %v719_v45, %v2184_v38  ;;  %v873_v49 = vmax.f32 %v716_v42, 0.0 }
 0x11f   : > { %v874_v48 = vmax.f32 %v718_v44, 0.0 }
 0x120   : > { %v875_v50 = vmax.f32 %v720_v46, 0.0 }
 0x121   : > { %v936_v51 = vpack.c.bf16 %v874_v48, %v872_v47 }
 0x122   : > { %v723_v52 = vpop.f32.mrb[4].mxu0  ;;  %v937_v53 = vpack.c.bf16 %v875_v50, %v873_v49 }
 0x123   : > { %v724_v54 = vadd.f32 %v723_v52, %v2180_v37  ;;  %v725_v55 = vpop.f32.mrb[5].mxu0 }
 0x124   : > { %v726_v56 = vadd.f32 %v725_v55, %v2184_v38  ;;  %v727_v57 = vpop.f32.mrb[6].mxu0  ;;  %1204 = vmatprep.mubr.bf16.mxu1 %v937_v53 }
 0x125   : > { %v728_v58 = vadd.f32 %v727_v57, %v2180_v37  ;;  %v729_v59 = vpop.f32.mrb[7].mxu0  ;;  %1205 = vmatmul.mubr.bf16.vlgmr.msra.gmra.mrb[0].mxu1 %v936_v51  ;;  %v876_v61 = vmax.f32 %v724_v54, 0.0 }
 0x126   : > { %v730_v60 = vadd.f32 %v729_v59, %v2184_v38  ;;  %v877_v63 = vmax.f32 %v726_v56, 0.0 }
 0x127   : > { %v878_v62 = vmax.f32 %v728_v58, 0.0 }
 0x128   : > { %v879_v0 = vmax.f32 %v730_v60, 0.0 }
 0x129   : > { %v938_v1 = vpack.c.bf16 %v878_v62, %v876_v61 }
 0x12a   : > { %v939_v2 = vpack.c.bf16 %v879_v0, %v877_v63  ;;  %v733_v3 = vpop.f32.mrb[8].mxu0 }
 0x12b   : > { %v734_v4 = vadd.f32 %v733_v3, %v2180_v37  ;;  %v735_v5 = vpop.f32.mrb[9].mxu0 }
 0x12c   : > { %v736_v6 = vadd.f32 %v735_v5, %v2184_v38  ;;  %v737_v7 = vpop.f32.mrb[10].mxu0  ;;  %1214 = vmatprep.mubr.bf16.mxu1 %v939_v2 }
 0x12d   : > { %v738_v8 = vadd.f32 %v737_v7, %v2180_v37  ;;  %v739_v9 = vpop.f32.mrb[11].mxu0  ;;  %1215 = vmatmul.mubr.bf16.gmra.mrb[4].mxu1 %v938_v1  ;;  %v880_v11 = vmax.f32 %v734_v4, 0.0 }
 0x12e   : > { %v740_v10 = vadd.f32 %v739_v9, %v2184_v38  ;;  %v881_v13 = vmax.f32 %v736_v6, 0.0 }
 0x12f   : > { %v882_v12 = vmax.f32 %v738_v8, 0.0 }
 0x130   : > { %v883_v14 = vmax.f32 %v740_v10, 0.0 }
 0x131   : > { %v940_v15 = vpack.c.bf16 %v882_v12, %v880_v11 }
 0x132   : > { %v941_v16 = vpack.c.bf16 %v883_v14, %v881_v13  ;;  %v743_v17 = vpop.f32.mrb[12].mxu0 }
 0x133   : > { %v744_v18 = vadd.f32 %v743_v17, %v2180_v37  ;;  %v745_v19 = vpop.f32.mrb[13].mxu0 }
 0x134   : > { %v746_v20 = vadd.f32 %v745_v19, %v2184_v38  ;;  %v747_v21 = vpop.f32.mrb[14].mxu0  ;;  %1224 = vmatprep.mubr.bf16.mxu1 %v941_v16 }
 0x135   : > { %v748_v22 = vadd.f32 %v747_v21, %v2180_v37  ;;  %v749_v23 = vpop.f32.mrb[15].mxu0  ;;  %1225 = vmatmul.mubr.bf16.gmra.mrb[8].mxu1 %v940_v15  ;;  %v884_v25 = vmax.f32 %v744_v18, 0.0 }
 0x136   : > { %v750_v24 = vadd.f32 %v749_v23, %v2184_v38  ;;  %v885_v27 = vmax.f32 %v746_v20, 0.0 }
 0x137   : > { %v886_v26 = vmax.f32 %v748_v22, 0.0 }
 0x138   : > { %v887_v28 = vmax.f32 %v750_v24, 0.0 }
 0x139   : > { %v942_v29 = vpack.c.bf16 %v886_v26, %v884_v25 }
 0x13a   : > { %v943_v30 = vpack.c.bf16 %v887_v28, %v885_v27  ;;  %v753_v31 = vpop.f32.mrb[16].mxu0 }
 0x13b   : > { %v754_v35 = vadd.f32 %v753_v31, %v2180_v37  ;;  %v755_v39 = vpop.f32.mrb[17].mxu0 }
 0x13c   : > { %v756_v40 = vadd.f32 %v755_v39, %v2184_v38  ;;  %v757_v41 = vpop.f32.mrb[18].mxu0  ;;  %1234 = vmatprep.mubr.bf16.mxu1 %v943_v30 }
 0x13d   : > { %v758_v42 = vadd.f32 %v757_v41, %v2180_v37  ;;  %v759_v43 = vpop.f32.mrb[19].mxu0  ;;  %1235 = vmatmul.mubr.bf16.gmra.mrb[12].mxu1 %v942_v29  ;;  %v888_v45 = vmax.f32 %v754_v35, 0.0 }
 0x13e   : > { %v760_v44 = vadd.f32 %v759_v43, %v2184_v38  ;;  %v889_v47 = vmax.f32 %v756_v40, 0.0 }
 0x13f   : > { %v890_v46 = vmax.f32 %v758_v42, 0.0 }
 0x140   : > { %v891_v48 = vmax.f32 %v760_v44, 0.0 }
 0x141   : > { %v944_v49 = vpack.c.bf16 %v890_v46, %v888_v45 }
 0x142   : > { %v945_v50 = vpack.c.bf16 %v891_v48, %v889_v47  ;;  %v763_v51 = vpop.f32.mrb[20].mxu0 }
 0x143   : > { %v764_v52 = vadd.f32 %v763_v51, %v2180_v37  ;;  %v765_v53 = vpop.f32.mrb[21].mxu0 }
 0x144   : > { %v766_v54 = vadd.f32 %v765_v53, %v2184_v38  ;;  %v767_v55 = vpop.f32.mrb[22].mxu0  ;;  %1244 = vmatprep.mubr.bf16.mxu1 %v945_v50 }
 0x145   : > { %v768_v56 = vadd.f32 %v767_v55, %v2180_v37  ;;  %v769_v57 = vpop.f32.mrb[23].mxu0  ;;  %1245 = vmatmul.mubr.bf16.gmra.mrb[16].mxu1 %v944_v49  ;;  %v892_v59 = vmax.f32 %v764_v52, 0.0 }
 0x146   : > { %v770_v58 = vadd.f32 %v769_v57, %v2184_v38  ;;  %v893_v61 = vmax.f32 %v766_v54, 0.0 }
 0x147   : > { %v894_v60 = vmax.f32 %v768_v56, 0.0 }
 0x148   : > { %v895_v62 = vmax.f32 %v770_v58, 0.0 }
 0x149   : > { %v946_v63 = vpack.c.bf16 %v894_v60, %v892_v59 }
 0x14a   : > { %v947_v0 = vpack.c.bf16 %v895_v62, %v893_v61  ;;  %v773_v1 = vpop.f32.mrb[24].mxu0 }
 0x14b   : > { %v774_v2 = vadd.f32 %v773_v1, %v2180_v37  ;;  %v775_v3 = vpop.f32.mrb[25].mxu0 }
 0x14c   : > { %v776_v4 = vadd.f32 %v775_v3, %v2184_v38  ;;  %v777_v5 = vpop.f32.mrb[26].mxu0  ;;  %1254 = vmatprep.mubr.bf16.mxu1 %v947_v0 }
 0x14d   : > { %v778_v6 = vadd.f32 %v777_v5, %v2180_v37  ;;  %v779_v7 = vpop.f32.mrb[27].mxu0  ;;  %1255 = vmatmul.mubr.bf16.gmra.mrb[20].mxu1 %v946_v63  ;;  %v896_v9 = vmax.f32 %v774_v2, 0.0 }
 0x14e   : > { %v780_v8 = vadd.f32 %v779_v7, %v2184_v38  ;;  %v897_v11 = vmax.f32 %v776_v4, 0.0 }
 0x14f   : > { %v898_v10 = vmax.f32 %v778_v6, 0.0 }
 0x150   : > { %v899_v12 = vmax.f32 %v780_v8, 0.0 }
 0x151   : > { %v948_v13 = vpack.c.bf16 %v898_v10, %v896_v9 }
 0x152   : > { %v949_v14 = vpack.c.bf16 %v899_v12, %v897_v11  ;;  %v783_v15 = vpop.f32.mrb[28].mxu0 }
 0x153   : > { %v784_v16 = vadd.f32 %v783_v15, %v2180_v37  ;;  %v785_v17 = vpop.f32.mrb[29].mxu0 }
 0x154   : > { %v786_v18 = vadd.f32 %v785_v17, %v2184_v38  ;;  %v787_v19 = vpop.f32.mrb[30].mxu0  ;;  %1264 = vmatprep.mubr.bf16.mxu1 %v949_v14 }
 0x155   : > { %v788_v20 = vadd.f32 %v787_v19, %v2180_v37  ;;  %v789_v21 = vpop.f32.mrb[31].mxu0  ;;  %1265 = vmatmul.mubr.bf16.gmra.mrb[24].mxu1 %v948_v13  ;;  %v900_v23 = vmax.f32 %v784_v16, 0.0 }
 0x156   : > { %v790_v22 = vadd.f32 %v789_v21, %v2184_v38  ;;  %v901_v25 = vmax.f32 %v786_v18, 0.0 }
 0x157   : > { %v902_v24 = vmax.f32 %v788_v20, 0.0 }
 0x158   : > { %v903_v26 = vmax.f32 %v790_v22, 0.0 }
 0x159   : > { %v950_v27 = vpack.c.bf16 %v902_v24, %v900_v23 }
 0x15a   : > { %v951_v28 = vpack.c.bf16 %v903_v26, %v901_v25  ;;  %v793_v29 = vpop.f32.mrb[32].mxu0 }
 0x15b   : > { %v794_v30 = vadd.f32 %v793_v29, %v2180_v37  ;;  %v795_v31 = vpop.f32.mrb[33].mxu0 }
 0x15c   : > { %v796_v35 = vadd.f32 %v795_v31, %v2184_v38  ;;  %v797_v39 = vpop.f32.mrb[34].mxu0  ;;  %1274 = vmatprep.mubr.bf16.mxu1 %v951_v28 }
 0x15d   : > { %v798_v40 = vadd.f32 %v797_v39, %v2180_v37  ;;  %v799_v41 = vpop.f32.mrb[35].mxu0  ;;  %1275 = vmatmul.mubr.bf16.gmra.mrb[28].mxu1 %v950_v27  ;;  %v904_v43 = vmax.f32 %v794_v30, 0.0 }
 0x15e   : > { %v800_v42 = vadd.f32 %v799_v41, %v2184_v38  ;;  %v905_v45 = vmax.f32 %v796_v35, 0.0 }
 0x15f   : > { %v906_v44 = vmax.f32 %v798_v40, 0.0 }
 0x160   : > { %v907_v46 = vmax.f32 %v800_v42, 0.0 }
 0x161   : > { %v952_v47 = vpack.c.bf16 %v906_v44, %v904_v43 }
 0x162   : > { %v953_v48 = vpack.c.bf16 %v907_v46, %v905_v45  ;;  %v803_v49 = vpop.f32.mrb[36].mxu0 }
 0x163   : > { %v804_v50 = vadd.f32 %v803_v49, %v2180_v37  ;;  %v805_v51 = vpop.f32.mrb[37].mxu0 }
 0x164   : > { %v806_v52 = vadd.f32 %v805_v51, %v2184_v38  ;;  %v807_v53 = vpop.f32.mrb[38].mxu0  ;;  %1284 = vmatprep.mubr.bf16.mxu1 %v953_v48 }
 0x165   : > { %v808_v54 = vadd.f32 %v807_v53, %v2180_v37  ;;  %v809_v55 = vpop.f32.mrb[39].mxu0  ;;  %1285 = vmatmul.mubr.bf16.gmra.mrb[32].mxu1 %v952_v47  ;;  %v908_v57 = vmax.f32 %v804_v50, 0.0 }
 0x166   : > { %v810_v56 = vadd.f32 %v809_v55, %v2184_v38  ;;  %v909_v59 = vmax.f32 %v806_v52, 0.0 }
 0x167   : > { %v910_v58 = vmax.f32 %v808_v54, 0.0 }
 0x168   : > { %v911_v60 = vmax.f32 %v810_v56, 0.0 }
 0x169   : > { %v954_v61 = vpack.c.bf16 %v910_v58, %v908_v57 }
 0x16a   : > { %v955_v62 = vpack.c.bf16 %v911_v60, %v909_v59  ;;  %v813_v63 = vpop.f32.mrb[40].mxu0 }
 0x16b   : > { %v814_v0 = vadd.f32 %v813_v63, %v2180_v37  ;;  %v815_v1 = vpop.f32.mrb[41].mxu0 }
 0x16c   : > { %v816_v2 = vadd.f32 %v815_v1, %v2184_v38  ;;  %v817_v3 = vpop.f32.mrb[42].mxu0  ;;  %1294 = vmatprep.mubr.bf16.mxu1 %v955_v62 }
 0x16d   : > { %v818_v4 = vadd.f32 %v817_v3, %v2180_v37  ;;  %v819_v5 = vpop.f32.mrb[43].mxu0  ;;  %1295 = vmatmul.mubr.bf16.gmra.mrb[36].mxu1 %v954_v61  ;;  %v912_v7 = vmax.f32 %v814_v0, 0.0 }
 0x16e   : > { %v820_v6 = vadd.f32 %v819_v5, %v2184_v38  ;;  %v913_v9 = vmax.f32 %v816_v2, 0.0 }
 0x16f   : > { %v914_v8 = vmax.f32 %v818_v4, 0.0 }
 0x170   : > { %v915_v10 = vmax.f32 %v820_v6, 0.0 }
 0x171   : > { %v956_v11 = vpack.c.bf16 %v914_v8, %v912_v7 }
 0x172   : > { %v957_v12 = vpack.c.bf16 %v915_v10, %v913_v9  ;;  %v823_v13 = vpop.f32.mrb[44].mxu0 }
 0x173   : > { %v824_v14 = vadd.f32 %v823_v13, %v2180_v37  ;;  %v825_v15 = vpop.f32.mrb[45].mxu0 }
 0x174   : > { %v826_v16 = vadd.f32 %v825_v15, %v2184_v38  ;;  %v827_v17 = vpop.f32.mrb[46].mxu0  ;;  %1304 = vmatprep.mubr.bf16.mxu1 %v957_v12 }
 0x175   : > { %v828_v18 = vadd.f32 %v827_v17, %v2180_v37  ;;  %v829_v19 = vpop.f32.mrb[47].mxu0  ;;  %1305 = vmatmul.mubr.bf16.gmra.mrb[40].mxu1 %v956_v11  ;;  %v916_v21 = vmax.f32 %v824_v14, 0.0 }
 0x176   : > { %v830_v20 = vadd.f32 %v829_v19, %v2184_v38  ;;  %v917_v23 = vmax.f32 %v826_v16, 0.0 }
 0x177   : > { %v918_v22 = vmax.f32 %v828_v18, 0.0 }
 0x178   : > { %v919_v24 = vmax.f32 %v830_v20, 0.0 }
 0x179   : > { %v958_v25 = vpack.c.bf16 %v918_v22, %v916_v21 }
 0x17a   : > { %v959_v26 = vpack.c.bf16 %v919_v24, %v917_v23  ;;  %v833_v27 = vpop.f32.mrb[48].mxu0 }
 0x17b   : > { %v834_v28 = vadd.f32 %v833_v27, %v2180_v37  ;;  %v835_v29 = vpop.f32.mrb[49].mxu0 }
 0x17c   : > { %v836_v30 = vadd.f32 %v835_v29, %v2184_v38  ;;  %v837_v31 = vpop.f32.mrb[50].mxu0  ;;  %1314 = vmatprep.mubr.bf16.mxu1 %v959_v26 }
 0x17d   : > { %v838_v35 = vadd.f32 %v837_v31, %v2180_v37  ;;  %v839_v39 = vpop.f32.mrb[51].mxu0  ;;  %1315 = vmatmul.mubr.bf16.gmra.mrb[44].mxu1 %v958_v25  ;;  %v920_v41 = vmax.f32 %v834_v28, 0.0  ;;  %v1000_v25 = vld [vmem:[%s2345_s4] sm:$0x3] }
 0x17e   : > { %v840_v40 = vadd.f32 %v839_v39, %v2184_v38  ;;  %v921_v43 = vmax.f32 %v836_v30, 0.0  ;;  %v2255_v26 = vrot.slane %v1000_v25, %v351_v34  ;;  %v1869_v39 = vld [vmem:[%s2346_s5 + $0x4] ss:$8 sps:$4 sm:$0xff]  }
 0x17f   : > { %v922_v42 = vmax.f32 %v838_v35, 0.0  ;;  %1505 = vmatprep.mubr.bf16.mxu0 %v1869_v39 }
 0x180   : > { %v923_v44 = vmax.f32 %v840_v40, 0.0 }
 0x181   : > { %v960_v45 = vpack.c.bf16 %v922_v42, %v920_v41 }
 0x182   : > { %v961_v46 = vpack.c.bf16 %v923_v44, %v921_v43  ;;  %v843_v47 = vpop.f32.mrb[52].mxu0 }
 0x183   : > { %v844_v48 = vadd.f32 %v843_v47, %v2180_v37  ;;  %v845_v49 = vpop.f32.mrb[53].mxu0 }
 0x184   : > { %v846_v50 = vadd.f32 %v845_v49, %v2184_v38  ;;  %v847_v51 = vpop.f32.mrb[54].mxu0  ;;  %1324 = vmatprep.mubr.bf16.mxu1 %v961_v46 }
 0x185   : > { %v848_v52 = vadd.f32 %v847_v51, %v2180_v37  ;;  %v849_v53 = vpop.f32.mrb[55].mxu0  ;;  %1325 = vmatmul.mubr.bf16.gmra.mrb[48].mxu1 %v960_v45  ;;  %v924_v55 = vmax.f32 %v844_v48, 0.0 }
 0x186   : > { %v850_v54 = vadd.f32 %v849_v53, %v2184_v38  ;;  %v925_v57 = vmax.f32 %v846_v50, 0.0 }
 0x187   : > { %v926_v56 = vmax.f32 %v848_v52, 0.0 }
 0x188   : > { %v927_v58 = vmax.f32 %v850_v54, 0.0 }
 0x189   : > { %v962_v59 = vpack.c.bf16 %v926_v56, %v924_v55 }
 0x18a   : > { %v963_v60 = vpack.c.bf16 %v927_v58, %v925_v57  ;;  %v853_v61 = vpop.f32.mrb[56].mxu0 }
 0x18b   : > { %v854_v62 = vadd.f32 %v853_v61, %v2180_v37  ;;  %v855_v63 = vpop.f32.mrb[57].mxu0 }
 0x18c   : > { %v856_v0 = vadd.f32 %v855_v63, %v2184_v38  ;;  %v857_v1 = vpop.f32.mrb[58].mxu0  ;;  %1334 = vmatprep.mubr.bf16.mxu1 %v963_v60 }
 0x18d   : > { %v858_v2 = vadd.f32 %v857_v1, %v2180_v37  ;;  %v859_v3 = vpop.f32.mrb[59].mxu0  ;;  %1335 = vmatmul.mubr.bf16.gmra.mrb[52].mxu1 %v962_v59  ;;  %v928_v5 = vmax.f32 %v854_v62, 0.0 }
 0x18e   : > { %v860_v4 = vadd.f32 %v859_v3, %v2184_v38  ;;  %v929_v7 = vmax.f32 %v856_v0, 0.0 }
 0x18f   : > { %v930_v6 = vmax.f32 %v858_v2, 0.0 }
 0x190   : > { %v931_v8 = vmax.f32 %v860_v4, 0.0 }
 0x191   : > { %v964_v9 = vpack.c.bf16 %v930_v6, %v928_v5 }
 0x192   : > { %v965_v10 = vpack.c.bf16 %v931_v8, %v929_v7  ;;  %v863_v11 = vpop.f32.mrb[60].mxu0 }
 0x193   : > { %v864_v12 = vadd.f32 %v863_v11, %v2180_v37  ;;  %v865_v13 = vpop.f32.mrb[61].mxu0 }
 0x194   : > { %v866_v14 = vadd.f32 %v865_v13, %v2184_v38  ;;  %v867_v15 = vpop.f32.mrb[62].mxu0  ;;  %1344 = vmatprep.mubr.bf16.mxu1 %v965_v10 }
 0x195   : > { %v868_v16 = vadd.f32 %v867_v15, %v2180_v37  ;;  %v869_v17 = vpop.f32.mrb[63].mxu0  ;;  %1345 = vmatmul.mubr.bf16.gmra.mrb[56].mxu1 %v964_v9  ;;  %v932_v19 = vmax.f32 %v864_v12, 0.0  ;;  %v2259_v37 = vrot.slane %v1000_v25, %v355_v36 }
 0x196   : > { %v870_v18 = vadd.f32 %v869_v17, %v2184_v38  ;;  %v933_v21 = vmax.f32 %v866_v14, 0.0 }
 0x197   : > { %v934_v20 = vmax.f32 %v868_v16, 0.0 }
 0x198   : > { %v935_v22 = vmax.f32 %v870_v18, 0.0 }
 0x199   : > { %v966_v23 = vpack.c.bf16 %v934_v20, %v932_v19 }
 0x19a   : > { %v967_v24 = vpack.c.bf16 %v935_v22, %v933_v21 }
 0x19c   : > { %1354 = vmatprep.mubr.bf16.mxu1 %v967_v24 }
 0x19d   : > { %1355 = vmatmul.mubr.bf16.gmra.mrb[60].mxu1 %v966_v23 }
 0x1f8   : > { %v1206_v38 = vpop.f32.mrb[0].mxu1 }
 0x1f9   : > { %v1207_v27 = vadd.f32 %v1206_v38, %v2255_v26  ;;  %v1208_v28 = vpop.f32.mrb[1].mxu1 }
 0x1fa   : > { %v1209_v29 = vadd.f32 %v1208_v28, %v2259_v37  ;;  %v1210_v30 = vpop.f32.mrb[2].mxu1 }
 0x1fb   : > { %v1211_v31 = vadd.f32 %v1210_v30, %v2255_v26  ;;  %v1212_v35 = vpop.f32.mrb[3].mxu1  ;;  %v1365_v40 = vmax.f32 %v1207_v27, 0.0 }
 0x1fc   : > { %v1213_v34 = vadd.f32 %v1212_v35, %v2259_v37  ;;  %v1366_v36 = vmax.f32 %v1209_v29, 0.0 }
 0x1fd   : > { %v1367_v41 = vmax.f32 %v1211_v31, 0.0 }
 0x1fe   : > { %v1368_v42 = vmax.f32 %v1213_v34, 0.0 }
 0x1ff   : > { %v1431_v43 = vpack.c.bf16 %v1367_v41, %v1365_v40 }
 0x200   : > { %v1432_v44 = vpack.c.bf16 %v1368_v42, %v1366_v36  ;;  %v1216_v45 = vpop.f32.mrb[4].mxu1 }
 0x201   : > { %v1217_v46 = vadd.f32 %v1216_v45, %v2255_v26  ;;  %v1218_v47 = vpop.f32.mrb[5].mxu1 }
 0x202   : > { %v1219_v48 = vadd.f32 %v1218_v47, %v2259_v37  ;;  %v1220_v49 = vpop.f32.mrb[6].mxu1  ;;  %1473 = vmatprep.subr.bf16.mxu0 %v1432_v44 }
 0x203   : > { %v1221_v50 = vadd.f32 %v1220_v49, %v2255_v26  ;;  %v1222_v51 = vpop.f32.mrb[7].mxu1  ;;  %1474 = vmatpush1.bf16.xpose.msra.mxu0 %v1431_v43  ;;  %v1369_v53 = vmax.f32 %v1217_v46, 0.0 }
 0x204   : > { %v1223_v52 = vadd.f32 %v1222_v51, %v2259_v37  ;;  %v1370_v55 = vmax.f32 %v1219_v48, 0.0 }
 0x205   : > { %v1371_v54 = vmax.f32 %v1221_v50, 0.0 }
 0x206   : > { %v1372_v56 = vmax.f32 %v1223_v52, 0.0 }
 0x207   : > { %v1433_v57 = vpack.c.bf16 %v1371_v54, %v1369_v53 }
 0x208   : > { %v1434_v58 = vpack.c.bf16 %v1372_v56, %v1370_v55  ;;  %v1226_v59 = vpop.f32.mrb[8].mxu1 }
 0x209   : > { %v1227_v60 = vadd.f32 %v1226_v59, %v2255_v26  ;;  %v1228_v61 = vpop.f32.mrb[9].mxu1 }
 0x20a   : > { %v1229_v62 = vadd.f32 %v1228_v61, %v2259_v37  ;;  %v1230_v63 = vpop.f32.mrb[10].mxu1  ;;  %1475 = vmatprep.subr.bf16.mxu0 %v1434_v58 }
 0x20b   : > { %v1231_v0 = vadd.f32 %v1230_v63, %v2255_v26  ;;  %v1232_v1 = vpop.f32.mrb[11].mxu1  ;;  %1476 = vmatpush1.bf16.xpose.msra.mxu0 %v1433_v57  ;;  %v1373_v3 = vmax.f32 %v1227_v60, 0.0 }
 0x20c   : > { %v1233_v2 = vadd.f32 %v1232_v1, %v2259_v37  ;;  %v1374_v5 = vmax.f32 %v1229_v62, 0.0 }
 0x20d   : > { %v1375_v4 = vmax.f32 %v1231_v0, 0.0 }
 0x20e   : > { %v1376_v6 = vmax.f32 %v1233_v2, 0.0 }
 0x20f   : > { %v1435_v7 = vpack.c.bf16 %v1375_v4, %v1373_v3 }
 0x210   : > { %v1436_v8 = vpack.c.bf16 %v1376_v6, %v1374_v5  ;;  %v1236_v9 = vpop.f32.mrb[12].mxu1 }
 0x211   : > { %v1237_v10 = vadd.f32 %v1236_v9, %v2255_v26  ;;  %v1238_v11 = vpop.f32.mrb[13].mxu1 }
 0x212   : > { %v1239_v12 = vadd.f32 %v1238_v11, %v2259_v37  ;;  %v1240_v13 = vpop.f32.mrb[14].mxu1  ;;  %1477 = vmatprep.subr.bf16.mxu0 %v1436_v8 }
 0x213   : > { %v1241_v14 = vadd.f32 %v1240_v13, %v2255_v26  ;;  %v1242_v15 = vpop.f32.mrb[15].mxu1  ;;  %1478 = vmatpush1.bf16.xpose.msra.mxu0 %v1435_v7  ;;  %v1377_v17 = vmax.f32 %v1237_v10, 0.0 }
 0x214   : > { %v1243_v16 = vadd.f32 %v1242_v15, %v2259_v37  ;;  %v1378_v19 = vmax.f32 %v1239_v12, 0.0 }
 0x215   : > { %v1379_v18 = vmax.f32 %v1241_v14, 0.0 }
 0x216   : > { %v1380_v20 = vmax.f32 %v1243_v16, 0.0 }
 0x217   : > { %v1437_v21 = vpack.c.bf16 %v1379_v18, %v1377_v17 }
 0x218   : > { %v1438_v22 = vpack.c.bf16 %v1380_v20, %v1378_v19  ;;  %v1246_v23 = vpop.f32.mrb[16].mxu1 }
 0x219   : > { %v1247_v24 = vadd.f32 %v1246_v23, %v2255_v26  ;;  %v1248_v25 = vpop.f32.mrb[17].mxu1 }
 0x21a   : > { %v1249_v38 = vadd.f32 %v1248_v25, %v2259_v37  ;;  %v1250_v27 = vpop.f32.mrb[18].mxu1  ;;  %1479 = vmatprep.subr.bf16.mxu0 %v1438_v22 }
 0x21b   : > { %v1251_v28 = vadd.f32 %v1250_v27, %v2255_v26  ;;  %v1252_v29 = vpop.f32.mrb[19].mxu1  ;;  %1480 = vmatpush1.bf16.xpose.msra.mxu0 %v1437_v21  ;;  %v1381_v31 = vmax.f32 %v1247_v24, 0.0 }
 0x21c   : > { %v1253_v30 = vadd.f32 %v1252_v29, %v2259_v37  ;;  %v1382_v39 = vmax.f32 %v1249_v38, 0.0 }
 0x21d   : > { %v1383_v35 = vmax.f32 %v1251_v28, 0.0 }
 0x21e   : > { %v1384_v34 = vmax.f32 %v1253_v30, 0.0 }
 0x21f   : > { %v1439_v40 = vpack.c.bf16 %v1383_v35, %v1381_v31 }
 0x220   : > { %v1440_v41 = vpack.c.bf16 %v1384_v34, %v1382_v39  ;;  %v1256_v36 = vpop.f32.mrb[20].mxu1 }
 0x221   : > { %v1257_v42 = vadd.f32 %v1256_v36, %v2255_v26  ;;  %v1258_v43 = vpop.f32.mrb[21].mxu1 }
 0x222   : > { %v1259_v44 = vadd.f32 %v1258_v43, %v2259_v37  ;;  %v1260_v45 = vpop.f32.mrb[22].mxu1  ;;  %1481 = vmatprep.subr.bf16.mxu0 %v1440_v41 }
 0x223   : > { %v1261_v46 = vadd.f32 %v1260_v45, %v2255_v26  ;;  %v1262_v47 = vpop.f32.mrb[23].mxu1  ;;  %1482 = vmatpush1.bf16.xpose.msra.mxu0 %v1439_v40  ;;  %v1385_v49 = vmax.f32 %v1257_v42, 0.0 }
 0x224   : > { %v1263_v48 = vadd.f32 %v1262_v47, %v2259_v37  ;;  %v1386_v51 = vmax.f32 %v1259_v44, 0.0 }
 0x225   : > { %v1387_v50 = vmax.f32 %v1261_v46, 0.0 }
 0x226   : > { %v1388_v52 = vmax.f32 %v1263_v48, 0.0 }
 0x227   : > { %v1441_v53 = vpack.c.bf16 %v1387_v50, %v1385_v49 }
 0x228   : > { %v1442_v54 = vpack.c.bf16 %v1388_v52, %v1386_v51  ;;  %v1266_v55 = vpop.f32.mrb[24].mxu1 }
 0x229   : > { %v1267_v56 = vadd.f32 %v1266_v55, %v2255_v26  ;;  %v1268_v57 = vpop.f32.mrb[25].mxu1 }
 0x22a   : > { %v1269_v58 = vadd.f32 %v1268_v57, %v2259_v37  ;;  %v1270_v59 = vpop.f32.mrb[26].mxu1  ;;  %1483 = vmatprep.subr.bf16.mxu0 %v1442_v54 }
 0x22b   : > { %v1271_v60 = vadd.f32 %v1270_v59, %v2255_v26  ;;  %v1272_v61 = vpop.f32.mrb[27].mxu1  ;;  %1484 = vmatpush1.bf16.xpose.msra.mxu0 %v1441_v53  ;;  %v1389_v63 = vmax.f32 %v1267_v56, 0.0 }
 0x22c   : > { %v1273_v62 = vadd.f32 %v1272_v61, %v2259_v37  ;;  %v1390_v1 = vmax.f32 %v1269_v58, 0.0 }
 0x22d   : > { %v1391_v0 = vmax.f32 %v1271_v60, 0.0 }
 0x22e   : > { %v1392_v2 = vmax.f32 %v1273_v62, 0.0 }
 0x22f   : > { %v1443_v3 = vpack.c.bf16 %v1391_v0, %v1389_v63 }
 0x230   : > { %v1444_v4 = vpack.c.bf16 %v1392_v2, %v1390_v1  ;;  %v1276_v5 = vpop.f32.mrb[28].mxu1 }
 0x231   : > { %v1277_v6 = vadd.f32 %v1276_v5, %v2255_v26  ;;  %v1278_v7 = vpop.f32.mrb[29].mxu1 }
 0x232   : > { %v1279_v8 = vadd.f32 %v1278_v7, %v2259_v37  ;;  %v1280_v9 = vpop.f32.mrb[30].mxu1  ;;  %1485 = vmatprep.subr.bf16.mxu0 %v1444_v4 }
 0x233   : > { %v1281_v10 = vadd.f32 %v1280_v9, %v2255_v26  ;;  %v1282_v11 = vpop.f32.mrb[31].mxu1  ;;  %1486 = vmatpush1.bf16.xpose.msra.mxu0 %v1443_v3  ;;  %v1393_v13 = vmax.f32 %v1277_v6, 0.0 }
 0x234   : > { %v1283_v12 = vadd.f32 %v1282_v11, %v2259_v37  ;;  %v1394_v15 = vmax.f32 %v1279_v8, 0.0 }
 0x235   : > { %v1395_v14 = vmax.f32 %v1281_v10, 0.0 }
 0x236   : > { %v1396_v16 = vmax.f32 %v1283_v12, 0.0 }
 0x237   : > { %v1445_v17 = vpack.c.bf16 %v1395_v14, %v1393_v13 }
 0x238   : > { %v1446_v18 = vpack.c.bf16 %v1396_v16, %v1394_v15  ;;  %v1286_v19 = vpop.f32.mrb[32].mxu1 }
 0x239   : > { %v1287_v20 = vadd.f32 %v1286_v19, %v2255_v26  ;;  %v1288_v21 = vpop.f32.mrb[33].mxu1 }
 0x23a   : > { %v1289_v22 = vadd.f32 %v1288_v21, %v2259_v37  ;;  %v1290_v23 = vpop.f32.mrb[34].mxu1  ;;  %1487 = vmatprep.subr.bf16.mxu0 %v1446_v18 }
 0x23b   : > { %v1291_v24 = vadd.f32 %v1290_v23, %v2255_v26  ;;  %v1292_v25 = vpop.f32.mrb[35].mxu1  ;;  %1488 = vmatpush1.bf16.xpose.msra.mxu0 %v1445_v17  ;;  %v1397_v27 = vmax.f32 %v1287_v20, 0.0 }
 0x23c   : > { %v1293_v38 = vadd.f32 %v1292_v25, %v2259_v37  ;;  %v1398_v29 = vmax.f32 %v1289_v22, 0.0 }
 0x23d   : > { %v1399_v28 = vmax.f32 %v1291_v24, 0.0 }
 0x23e   : > { %v1400_v30 = vmax.f32 %v1293_v38, 0.0 }
 0x23f   : > { %v1447_v31 = vpack.c.bf16 %v1399_v28, %v1397_v27 }
 0x240   : > { %v1448_v35 = vpack.c.bf16 %v1400_v30, %v1398_v29  ;;  %v1296_v39 = vpop.f32.mrb[36].mxu1 }
 0x241   : > { %v1297_v34 = vadd.f32 %v1296_v39, %v2255_v26  ;;  %v1298_v40 = vpop.f32.mrb[37].mxu1 }
 0x242   : > { %v1299_v41 = vadd.f32 %v1298_v40, %v2259_v37  ;;  %v1300_v36 = vpop.f32.mrb[38].mxu1  ;;  %1489 = vmatprep.subr.bf16.mxu0 %v1448_v35 }
 0x243   : > { %v1301_v42 = vadd.f32 %v1300_v36, %v2255_v26  ;;  %v1302_v43 = vpop.f32.mrb[39].mxu1  ;;  %1490 = vmatpush1.bf16.xpose.msra.mxu0 %v1447_v31  ;;  %v1401_v45 = vmax.f32 %v1297_v34, 0.0 }
 0x244   : > { %v1303_v44 = vadd.f32 %v1302_v43, %v2259_v37  ;;  %v1402_v47 = vmax.f32 %v1299_v41, 0.0 }
 0x245   : > { %v1403_v46 = vmax.f32 %v1301_v42, 0.0 }
 0x246   : > { %v1404_v48 = vmax.f32 %v1303_v44, 0.0 }
 0x247   : > { %v1449_v49 = vpack.c.bf16 %v1403_v46, %v1401_v45 }
 0x248   : > { %v1450_v50 = vpack.c.bf16 %v1404_v48, %v1402_v47  ;;  %v1306_v51 = vpop.f32.mrb[40].mxu1 }
 0x249   : > { %v1307_v52 = vadd.f32 %v1306_v51, %v2255_v26  ;;  %v1308_v53 = vpop.f32.mrb[41].mxu1 }
 0x24a   : > { %v1309_v54 = vadd.f32 %v1308_v53, %v2259_v37  ;;  %v1310_v55 = vpop.f32.mrb[42].mxu1  ;;  %1491 = vmatprep.subr.bf16.mxu0 %v1450_v50 }
 0x24b   : > { %v1311_v56 = vadd.f32 %v1310_v55, %v2255_v26  ;;  %v1312_v57 = vpop.f32.mrb[43].mxu1  ;;  %1492 = vmatpush1.bf16.xpose.msra.mxu0 %v1449_v49  ;;  %v1405_v59 = vmax.f32 %v1307_v52, 0.0 }
 0x24c   : > { %v1313_v58 = vadd.f32 %v1312_v57, %v2259_v37  ;;  %v1406_v61 = vmax.f32 %v1309_v54, 0.0 }
 0x24d   : > { %v1407_v60 = vmax.f32 %v1311_v56, 0.0 }
 0x24e   : > { %v1408_v62 = vmax.f32 %v1313_v58, 0.0 }
 0x24f   : > { %v1451_v63 = vpack.c.bf16 %v1407_v60, %v1405_v59 }
 0x250   : > { %v1452_v0 = vpack.c.bf16 %v1408_v62, %v1406_v61  ;;  %v1316_v1 = vpop.f32.mrb[44].mxu1 }
 0x251   : > { %v1317_v2 = vadd.f32 %v1316_v1, %v2255_v26  ;;  %v1318_v3 = vpop.f32.mrb[45].mxu1 }
 0x252   : > { %v1319_v4 = vadd.f32 %v1318_v3, %v2259_v37  ;;  %v1320_v5 = vpop.f32.mrb[46].mxu1  ;;  %1493 = vmatprep.subr.bf16.mxu0 %v1452_v0 }
 0x253   : > { %v1321_v6 = vadd.f32 %v1320_v5, %v2255_v26  ;;  %v1322_v7 = vpop.f32.mrb[47].mxu1  ;;  %1494 = vmatpush1.bf16.xpose.msra.mxu0 %v1451_v63  ;;  %v1409_v9 = vmax.f32 %v1317_v2, 0.0 }
 0x254   : > { %v1323_v8 = vadd.f32 %v1322_v7, %v2259_v37  ;;  %v1410_v11 = vmax.f32 %v1319_v4, 0.0 }
 0x255   : > { %v1411_v10 = vmax.f32 %v1321_v6, 0.0 }
 0x256   : > { %v1412_v12 = vmax.f32 %v1323_v8, 0.0 }
 0x257   : > { %v1453_v13 = vpack.c.bf16 %v1411_v10, %v1409_v9 }
 0x258   : > { %v1454_v14 = vpack.c.bf16 %v1412_v12, %v1410_v11  ;;  %v1326_v15 = vpop.f32.mrb[48].mxu1  ;;  %v1867_v11 = vld [vmem:[%s2346_s5] ss:$8 sps:$4 sm:$0xff]   ;;  %v1515_v12 = vstv %s1514_s17 }
 0x259   : > { %v1327_v16 = vadd.f32 %v1326_v15, %v2255_v26  ;;  %v1328_v17 = vpop.f32.mrb[49].mxu1 }
 0x25a   : > { %v1329_v18 = vadd.f32 %v1328_v17, %v2259_v37  ;;  %v1330_v19 = vpop.f32.mrb[50].mxu1  ;;  %1495 = vmatprep.subr.bf16.mxu0 %v1454_v14 }
 0x25b   : > { %v1331_v20 = vadd.f32 %v1330_v19, %v2255_v26  ;;  %v1332_v21 = vpop.f32.mrb[51].mxu1  ;;  %1496 = vmatpush1.bf16.xpose.msra.mxu0 %v1453_v13  ;;  %v1413_v23 = vmax.f32 %v1327_v16, 0.0 }
 0x25c   : > { %v1333_v22 = vadd.f32 %v1332_v21, %v2259_v37  ;;  %v1414_v25 = vmax.f32 %v1329_v18, 0.0 }
 0x25d   : > { %v1415_v24 = vmax.f32 %v1331_v20, 0.0 }
 0x25e   : > { %v1416_v38 = vmax.f32 %v1333_v22, 0.0 }
 0x25f   : > { %v1455_v27 = vpack.c.bf16 %v1415_v24, %v1413_v23 }
 0x260   : > { %v1456_v28 = vpack.c.bf16 %v1416_v38, %v1414_v25  ;;  %v1336_v29 = vpop.f32.mrb[52].mxu1  ;;  %v1886_v25 = vmov 1966171168  }
 0x261   : > { %v1337_v30 = vadd.f32 %v1336_v29, %v2255_v26  ;;  %v1338_v31 = vpop.f32.mrb[53].mxu1  ;;  %v1532_v38 = vunpack.c.l.s4 %v1886_v25 }
 0x262   : > { %v1339_v35 = vadd.f32 %v1338_v31, %v2259_v37  ;;  %v1340_v39 = vpop.f32.mrb[54].mxu1  ;;  %1497 = vmatprep.subr.bf16.mxu0 %v1456_v28 }
 0x263   : > { %v1341_v34 = vadd.f32 %v1340_v39, %v2255_v26  ;;  %v1342_v40 = vpop.f32.mrb[55].mxu1  ;;  %1498 = vmatpush1.bf16.xpose.msra.mxu0 %v1455_v27  ;;  %v1417_v36 = vmax.f32 %v1337_v30, 0.0  ;;  %v1533_v27 = vunpack.c.0.s8 %v1532_v38 }
 0x264   : > { %v1343_v41 = vadd.f32 %v1342_v40, %v2259_v37  ;;  %v1418_v43 = vmax.f32 %v1339_v35, 0.0 }
 0x265   : > { %v1419_v42 = vmax.f32 %v1341_v34, 0.0  ;;  %v1536_v29 = vsub.s32 %v1533_v27, %v2171_v33 }
 0x266   : > { %v1420_v44 = vmax.f32 %v1343_v41, 0.0 }
 0x267   : > { %v1457_v45 = vpack.c.bf16 %v1419_v42, %v1417_v36 }
 0x268   : > { %v1458_v46 = vpack.c.bf16 %v1420_v44, %v1418_v43  ;;  %v1346_v47 = vpop.f32.mrb[56].mxu1 }
 0x269   : > { %v1347_v48 = vadd.f32 %v1346_v47, %v2255_v26  ;;  %v1348_v49 = vpop.f32.mrb[57].mxu1 }
 0x26a   : > { %v1349_v50 = vadd.f32 %v1348_v49, %v2259_v37  ;;  %v1350_v51 = vpop.f32.mrb[58].mxu1  ;;  %1499 = vmatprep.subr.bf16.mxu0 %v1458_v46 }
 0x26b   : > { %v1351_v52 = vadd.f32 %v1350_v51, %v2255_v26  ;;  %v1352_v53 = vpop.f32.mrb[59].mxu1  ;;  %1500 = vmatpush1.bf16.xpose.msra.mxu0 %v1457_v45  ;;  %v1421_v55 = vmax.f32 %v1347_v48, 0.0 }
 0x26c   : > { %v1353_v54 = vadd.f32 %v1352_v53, %v2259_v37  ;;  %v1422_v57 = vmax.f32 %v1349_v50, 0.0 }
 0x26d   : > { %v1423_v56 = vmax.f32 %v1351_v52, 0.0 }
 0x26e   : > { %v1424_v58 = vmax.f32 %v1353_v54, 0.0 }
 0x26f   : > { %v1459_v59 = vpack.c.bf16 %v1423_v56, %v1421_v55 }
 0x270   : > { %v1460_v60 = vpack.c.bf16 %v1424_v58, %v1422_v57  ;;  %v1356_v61 = vpop.f32.mrb[60].mxu1 }
 0x271   : > { %v1357_v62 = vadd.f32 %v1356_v61, %v2255_v26  ;;  %v1358_v63 = vpop.f32.mrb[61].mxu1 }
 0x272   : > { %v1359_v0 = vadd.f32 %v1358_v63, %v2259_v37  ;;  %v1360_v1 = vpop.f32.mrb[62].mxu1  ;;  %1501 = vmatprep.subr.bf16.mxu0 %v1460_v60 }
 0x273   : > { %v1361_v2 = vadd.f32 %v1360_v1, %v2255_v26  ;;  %v1362_v3 = vpop.f32.mrb[63].mxu1  ;;  %1502 = vmatpush1.bf16.xpose.msra.mxu0 %v1459_v59  ;;  %v1425_v5 = vmax.f32 %v1357_v62, 0.0 }
 0x274   : > { %v1363_v4 = vadd.f32 %v1362_v3, %v2259_v37  ;;  %v1426_v7 = vmax.f32 %v1359_v0, 0.0 }
 0x275   : > { %v1427_v6 = vmax.f32 %v1361_v2, 0.0 }
 0x276   : > { %v1428_v8 = vmax.f32 %v1363_v4, 0.0 }
 0x277   : > { %v1461_v9 = vpack.c.bf16 %v1427_v6, %v1425_v5 }
 0x278   : > { %v1462_v10 = vpack.c.bf16 %v1428_v8, %v1426_v7 }
 0x27a   : > { %1503 = vmatprep.subr.bf16.mxu0 %v1462_v10 }
 0x27b   : > { %1504 = vmatpush1.bf16.xpose.msra.mxu0 %v1461_v9 }
 0x282   : > { %1506 = vmatmul.mubr.bf16.vlgmr.msra.gmra.mrb[64].mxu0 %v1867_v11 }
 0x355   : > { %v1507_v26 = vpop.f32.mrb[64].mxu0 }
 0x356   : > { %v1516_v13 = vadd.f32 %v1515_v12, %v1507_v26  ;;  %v1509_v14 = vpop.f32.mrb[65].mxu0 }
 0x357   : > { %v1517_v15 = vadd.f32 %v1515_v12, %v1509_v14  ;;  %v1511_v37 = vpop.f32.mrb[66].mxu0 }
 0x358   : > { %v1518_v16 = vsub.f32 0.0, %v1516_v13  ;;  %v1512_v17 = vpop.f32.mrb[67].mxu0 }
 0x359   : > { %v1519_v18 = vsub.f32 0.0, %v1517_v15 }
 0x35a   : > { %v1520_v19 = vmul.f32 1.442695, %v1518_v16 }
 0x35b   : > { %v1522_v20 = vmul.f32 1.442695, %v1519_v18 }
 0x35c   : > { %1870 = vpow2.f32 %v1520_v19 }
 0x35d   : > { %1872 = vpow2.f32 %v1522_v20 }
 0x366   : > { %v1871_v21 = vpop.eup %1870 }
 0x367   : > { %v1873_v22 = vpop.eup %1872  ;;  %v1524_v23 = vadd.f32 1.0, %v1871_v21 }
 0x368   : > { %v1525_v24 = vadd.f32 1.0, %v1873_v22 }
 0x369   : > { %1874 = vrcp.f32 %v1524_v23 }
 0x36a   : > { %1876 = vrcp.f32 %v1525_v24 }
 0x373   : > { %v1875_v28 = vpop.eup %1874 }
 0x374   : > { %v1877_v30 = vpop.eup %1876 }
 0x375   : > { %v1530_v31 = vcombine.low %v1875_v28, %v1877_v30 }
 0x377   : > { %v1537_v35 = vrot.slane %v1530_v31, %v1536_v29 }
 0x379   : > { %v1544_v39 = vrot.slane %v1537_v35, %v1536_v29 }
 0x37b   : > { %1550 = vst.msk [vmem:[%s282_s21] sm:$0x3] %vm1548_vm0, %v1544_v39 }
 0x37c PF: > { %s18_s26 = sadd.s32 1, %s1884_s26  }
 0x37d   : > { %p15_p5 = scmp.ge.s32.totalorder %s18_s26, 4  }
 0x37f   :  { %17 = sbr.rel (!%p15_p5) target bundleno = 2 (0x2), region = 78 }

</bundles_post_ra>
